<compile_context>
chip_gen: v7x
topology: tpu7x:2x2x1
jax: 0.10.0
libtpu: 0.0.40
codegen_flags: <defaults>
</compile_context>

<pallas_src>
import functools
import math

import jax
import jax.numpy as jnp
from jax.experimental import pallas as pl
from jax.experimental.pallas import tpu as pltpu

EMBED = 32
HEADS = 4
DK = EMBED // HEADS
FF_HIDDEN = 64
LN_EPS = 1e-5  # torch.nn.LayerNorm default

# f32 by default for exact parity with the f32 PyTorch module.
# Set to jnp.bfloat16 on v6e/v7x (MXU operands only; accumulation stays f32).
MATMUL_DTYPE = jnp.float32


def _layernorm(x, gamma, beta):
    # x: (N, D); gamma/beta: (1, D); normalize over last dim (matches nn.LayerNorm(D))
    mean = jnp.mean(x, axis=-1, keepdims=True)
    var = jnp.mean((x - mean) * (x - mean), axis=-1, keepdims=True)
    inv = jax.lax.rsqrt(var + LN_EPS)
    return (x - mean) * inv * gamma + beta


def encoder_layer_kernel(x_ref, w_ref, vec_ref, o_ref, *, batch, seq):
    D, H, dk, F = EMBED, HEADS, DK, FF_HIDDEN
    n = batch * seq

    x = x_ref[...]                       # (n, D) f32

    # ---- unpack packed parameter slabs ----
    w = w_ref[...]                       # (D, 256) = [Wqkv(96) | Wo(32) | W1(64) | W2^T(64)]
    wqkv = w[:, 0:3 * D]                 # Wq already pre-scaled by 1/sqrt(dk)
    wo   = w[:, 3 * D:4 * D]
    w1   = w[:, 4 * D:4 * D + F]
    w2t  = w[:, 4 * D + F:4 * D + 2 * F]

    vec = vec_ref[...]                   # (8, 128): one padded row per vector
    bqkv = vec[0:1, 0:3 * D]
    bo   = vec[1:2, 0:D]
    b1   = vec[2:3, 0:F]
    b2   = vec[3:4, 0:D]
    g1   = vec[4:5, 0:D]
    be1  = vec[5:6, 0:D]
    g2   = vec[6:7, 0:D]
    be2  = vec[7:8, 0:D]

    def mm(a, b):                        # 2-D MXU matmul, f32 accumulation
        return jnp.dot(a.astype(MATMUL_DTYPE), b.astype(MATMUL_DTYPE),
                       preferred_element_type=jnp.float32)

    # ---- fused QKV projection (one MXU pass, lane width 96) ----
    qkv = mm(x, wqkv) + bqkv             # (n, 3D)

    # ---- multi-head self-attention, batched over (H*B) ----
    def heads(z):                        # (n, D) -> (H*B, S, dk), head-major stacking
        z3 = z.reshape(batch, seq, D)
        return jnp.concatenate(
            [z3[:, :, h * dk:(h + 1) * dk] for h in range(H)], axis=0)

    q = heads(qkv[:, 0:D])
    k = heads(qkv[:, D:2 * D])
    v = heads(qkv[:, 2 * D:3 * D])

    # scores: contract dk of both operands directly (no kh.T); scale folded into Wq/bq
    s = jnp.einsum('bqd,bkd->bqk',
                   q.astype(MATMUL_DTYPE), k.astype(MATMUL_DTYPE),
                   preferred_element_type=jnp.float32)        # (H*B, S, S)
    m = jnp.max(s, axis=-1, keepdims=True)
    p = jnp.exp(s - m)
    attn = p * pl.reciprocal(jnp.sum(p, axis=-1, keepdims=True), approx=True)
    ctx = jnp.einsum('bqk,bkd->bqd',
                     attn.astype(MATMUL_DTYPE), v.astype(MATMUL_DTYPE),
                     preferred_element_type=jnp.float32)      # (H*B, S, dk)

    # heads back onto the feature axis: (H*B, S, dk) -> (B, S, D) -> (n, D)
    ctx = jnp.concatenate([ctx[h * batch:(h + 1) * batch] for h in range(H)], axis=-1)
    ctx = ctx.reshape(n, D)

    attn_out = mm(ctx, wo) + bo

    # ---- Add & LayerNorm 1 ----
    y = _layernorm(x + attn_out, g1, be1)

    # ---- FeedForward: Linear -> ReLU -> Linear ----
    h1 = jnp.maximum(mm(y, w1) + b1, 0.0)
    ff = jax.lax.dot_general(                                  # h1 @ W2 via W2^T, no transpose
        h1.astype(MATMUL_DTYPE), w2t.astype(MATMUL_DTYPE),
        dimension_numbers=(((1,), (1,)), ((), ())),
        preferred_element_type=jnp.float32) + b2

    # ---- Add & LayerNorm 2 ----
    z = _layernorm(y + ff, g2, be2)
    o_ref[...] = z.astype(o_ref.dtype)


def pack_params(params):
    """Fold the attention scale into Wq/bq and pack everything into 2 slabs."""
    scale = 1.0 / math.sqrt(DK)
    wq = params["wq"] * scale
    bq = params["bq"] * scale

    wqkv = jnp.concatenate([wq, params["wk"], params["wv"]], axis=1)       # (32, 96)
    w_slab = jnp.concatenate(                                              # (32, 256)
        [wqkv, params["wo"], params["w1"], params["w2"].T], axis=1)

    def row(v):
        v = v.reshape(-1)
        return jnp.pad(v, (0, 128 - v.shape[0]))

    bqkv = jnp.concatenate(
        [bq.reshape(-1), params["bk"].reshape(-1), params["bv"].reshape(-1)])
    vec_slab = jnp.stack([                                                 # (8, 128)
        row(bqkv), row(params["bo"]), row(params["b1"]), row(params["b2"]),
        row(params["ln1_g"]), row(params["ln1_b"]),
        row(params["ln2_g"]), row(params["ln2_b"]),
    ])
    return w_slab.astype(jnp.float32), vec_slab.astype(jnp.float32)


def transformer_encoder_layer(x, params):
    """x: (B, S, D) float32; params: dict of (in, out)-layout weights."""
    B, S, D = x.shape
    assert D == EMBED
    n = B * S
    w_slab, vec_slab = pack_params(params)

    kernel = functools.partial(encoder_layer_kernel, batch=B, seq=S)
    out2d = pl.pallas_call(
        kernel,
        out_shape=jax.ShapeDtypeStruct((n, D), jnp.float32),
        grid_spec=pltpu.PrefetchScalarGridSpec(
            num_scalar_prefetch=0,
            grid=(1,),
            in_specs=[
                pl.BlockSpec((n, D), lambda i: (0, 0)),                  # activations
                pl.BlockSpec(w_slab.shape, lambda i: (0, 0)),            # weight slab
                pl.BlockSpec(vec_slab.shape, lambda i: (0, 0)),          # bias/LN slab
            ],
            out_specs=pl.BlockSpec((n, D), lambda i: (0, 0)),
        ),
        compiler_params=pltpu.CompilerParams(
            dimension_semantics=("arbitrary",)),
    )(x.reshape(n, D), w_slab, vec_slab)
    return out2d.reshape(B, S, D)


def init_params(key):
    # Deterministic synthetic init. Linear weights stored as (in, out) so the kernel
    # computes x @ W + b (equivalent to PyTorch's x @ W_torch.T + b).
    ks = jax.random.split(key, 6)

    def lin(k, fan_in, fan_out):
        bound = 1.0 / math.sqrt(fan_in)
        kw, kb = jax.random.split(k)
        w = jax.random.uniform(kw, (fan_in, fan_out), jnp.float32, -bound, bound)
        b = jax.random.uniform(kb, (1, fan_out), jnp.float32, -bound, bound)
        return w, b

    wq, bq = lin(ks[0], EMBED, EMBED)
    wk, bk = lin(ks[1], EMBED, EMBED)
    wv, bv = lin(ks[2], EMBED, EMBED)
    wo, bo = lin(ks[3], EMBED, EMBED)
    w1, b1 = lin(ks[4], EMBED, FF_HIDDEN)
    w2, b2 = lin(ks[5], FF_HIDDEN, EMBED)

    return dict(
        wq=wq, bq=bq, wk=wk, bk=bk, wv=wv, bv=bv, wo=wo, bo=bo,
        ln1_g=jnp.ones((1, EMBED), jnp.float32), ln1_b=jnp.zeros((1, EMBED), jnp.float32),
        w1=w1, b1=b1, w2=w2, b2=b2,
        ln2_g=jnp.ones((1, EMBED), jnp.float32), ln2_b=jnp.zeros((1, EMBED), jnp.float32),
    )


def reference(x, params):
    """Pure-JAX (XLA) reference matching the PyTorch TransformerEncoderLayer forward."""
    B, S, D = x.shape
    scale = 1.0 / math.sqrt(DK)
    lin = lambda z, w, b: jnp.dot(z, w) + b

    q = lin(x, params["wq"], params["bq"])
    k = lin(x, params["wk"], params["bk"])
    v = lin(x, params["wv"], params["bv"])
    split = lambda z: z.reshape(B, S, HEADS, DK).transpose(0, 2, 1, 3)    # (B,H,S,dk)
    qh, kh, vh = split(q), split(k), split(v)
    s = jnp.einsum('bhqd,bhkd->bhqk', qh, kh) * scale
    a = jax.nn.softmax(s, axis=-1)
    ctx = jnp.einsum('bhqk,bhkd->bhqd', a, vh).transpose(0, 2, 1, 3).reshape(B, S, D)
    attn_out = lin(ctx, params["wo"], params["bo"])

    def ln(z, g, b):
        mu = z.mean(-1, keepdims=True)
        var = ((z - mu) ** 2).mean(-1, keepdims=True)
        return (z - mu) * jax.lax.rsqrt(var + LN_EPS) * g + b

    y = ln(x + attn_out, params["ln1_g"], params["ln1_b"])
    h1 = jax.nn.relu(lin(y, params["w1"], params["b1"]))
    ff = lin(h1, params["w2"], params["b2"])
    return ln(y + ff, params["ln2_g"], params["ln2_b"])


if __name__ == "__main__":
    key = jax.random.PRNGKey(0)
    kx, kp = jax.random.split(key)

    B, S = 2, 10  # matches the module's usage: src = randint(0, vocab, (2, 10))
    x = jax.random.normal(kx, (B, S, EMBED), jnp.float32)
    params = init_params(kp)

    out = jax.jit(transformer_encoder_layer)(x, params)
    out = jax.block_until_ready(out)
    assert out.shape == (B, S, EMBED)

    ref = reference(x, params)
    err = float(jnp.max(jnp.abs(out - ref)))
    assert err < 2e-2, f"max abs err vs reference: {err}"

    print("KERNEL_OK")
</pallas_src>

<mosaic_0001>
module attributes {stable_mosaic.version = 11 : i64} {
  func.func @encoder_layer_kernel(%arg0: i32, %arg1: memref<20x32xf32, #tpu.memory_space<vmem>>, %arg2: memref<32x256xf32, #tpu.memory_space<vmem>>, %arg3: memref<8x128xf32, #tpu.memory_space<vmem>>, %arg4: memref<20x32xf32, #tpu.memory_space<vmem>>) attributes {dimension_semantics = [#tpu.dimension_semantics<arbitrary>], iteration_bounds = array<i64: 1>, scalar_prefetch = 0 : i64, scratch_operands = 0 : i64, tpu.core_type = #tpu.core_type<tc>, window_params = [{pipeline_mode = #tpu.pipeline_mode<synchronous>, transform_indices = @transform_0, window_bounds = array<i64: 20, 32>}, {pipeline_mode = #tpu.pipeline_mode<synchronous>, transform_indices = @transform_1, window_bounds = array<i64: 32, 256>}, {pipeline_mode = #tpu.pipeline_mode<synchronous>, transform_indices = @transform_2, window_bounds = array<i64: 8, 128>}, {pipeline_mode = #tpu.pipeline_mode<synchronous>, transform_indices = @transform_3, window_bounds = array<i64: 20, 32>}]} {
    %c0 = arith.constant 0 : index
    %c0_0 = arith.constant 0 : index
    %0 = vector.load %arg1[%c0, %c0_0] : memref<20x32xf32, #tpu.memory_space<vmem>>, vector<20x32xf32>
    %c0_1 = arith.constant 0 : index
    %c0_2 = arith.constant 0 : index
    %1 = vector.load %arg2[%c0_1, %c0_2] : memref<32x256xf32, #tpu.memory_space<vmem>>, vector<32x256xf32>
    %2 = vector.extract_strided_slice %1 {offsets = [0, 0], sizes = [32, 96], strides = [1, 1]} : vector<32x256xf32> to vector<32x96xf32>
    %3 = vector.extract_strided_slice %1 {offsets = [0, 96], sizes = [32, 32], strides = [1, 1]} : vector<32x256xf32> to vector<32x32xf32>
    %4 = vector.extract_strided_slice %1 {offsets = [0, 128], sizes = [32, 64], strides = [1, 1]} : vector<32x256xf32> to vector<32x64xf32>
    %5 = vector.extract_strided_slice %1 {offsets = [0, 192], sizes = [32, 64], strides = [1, 1]} : vector<32x256xf32> to vector<32x64xf32>
    %c0_3 = arith.constant 0 : index
    %c0_4 = arith.constant 0 : index
    %6 = vector.load %arg3[%c0_3, %c0_4] : memref<8x128xf32, #tpu.memory_space<vmem>>, vector<8x128xf32>
    %7 = vector.extract_strided_slice %6 {offsets = [0, 0], sizes = [1, 96], strides = [1, 1]} : vector<8x128xf32> to vector<1x96xf32>
    %8 = vector.extract_strided_slice %6 {offsets = [1, 0], sizes = [1, 32], strides = [1, 1]} : vector<8x128xf32> to vector<1x32xf32>
    %9 = vector.extract_strided_slice %6 {offsets = [2, 0], sizes = [1, 64], strides = [1, 1]} : vector<8x128xf32> to vector<1x64xf32>
    %10 = vector.extract_strided_slice %6 {offsets = [3, 0], sizes = [1, 32], strides = [1, 1]} : vector<8x128xf32> to vector<1x32xf32>
    %11 = vector.extract_strided_slice %6 {offsets = [4, 0], sizes = [1, 32], strides = [1, 1]} : vector<8x128xf32> to vector<1x32xf32>
    %12 = vector.extract_strided_slice %6 {offsets = [5, 0], sizes = [1, 32], strides = [1, 1]} : vector<8x128xf32> to vector<1x32xf32>
    %13 = vector.extract_strided_slice %6 {offsets = [6, 0], sizes = [1, 32], strides = [1, 1]} : vector<8x128xf32> to vector<1x32xf32>
    %14 = vector.extract_strided_slice %6 {offsets = [7, 0], sizes = [1, 32], strides = [1, 1]} : vector<8x128xf32> to vector<1x32xf32>
    %cst = arith.constant dense<0.000000e+00> : vector<20x96xf32>
    %15 = tpu.matmul %0, %2, %cst {dimension_numbers = #tpu.dot_dimension_numbers<[1], [0], [0], [1], [0, 0, 1, 1], [], []>} : vector<20x32xf32>, vector<32x96xf32>, vector<20x96xf32> -> vector<20x96xf32>
    %16 = vector.broadcast %7 : vector<1x96xf32> to vector<20x96xf32>
    %17 = arith.addf %15, %16 : vector<20x96xf32>
    %18 = vector.extract_strided_slice %17 {offsets = [0, 0], sizes = [20, 32], strides = [1, 1]} : vector<20x96xf32> to vector<20x32xf32>
    %19 = vector.shape_cast %18 : vector<20x32xf32> to vector<2x10x32xf32>
    %20 = vector.extract_strided_slice %19 {offsets = [0, 0, 0], sizes = [2, 10, 8], strides = [1, 1, 1]} : vector<2x10x32xf32> to vector<2x10x8xf32>
    %21 = vector.extract_strided_slice %19 {offsets = [0, 0, 8], sizes = [2, 10, 8], strides = [1, 1, 1]} : vector<2x10x32xf32> to vector<2x10x8xf32>
    %22 = vector.extract_strided_slice %19 {offsets = [0, 0, 16], sizes = [2, 10, 8], strides = [1, 1, 1]} : vector<2x10x32xf32> to vector<2x10x8xf32>
    %23 = vector.extract_strided_slice %19 {offsets = [0, 0, 24], sizes = [2, 10, 8], strides = [1, 1, 1]} : vector<2x10x32xf32> to vector<2x10x8xf32>
    %24 = tpu.concatenate %20, %21, %22, %23 in 0 : vector<2x10x8xf32>, vector<2x10x8xf32>, vector<2x10x8xf32>, vector<2x10x8xf32> -> vector<8x10x8xf32>
    %25 = vector.extract_strided_slice %17 {offsets = [0, 32], sizes = [20, 32], strides = [1, 1]} : vector<20x96xf32> to vector<20x32xf32>
    %26 = vector.shape_cast %25 : vector<20x32xf32> to vector<2x10x32xf32>
    %27 = vector.extract_strided_slice %26 {offsets = [0, 0, 0], sizes = [2, 10, 8], strides = [1, 1, 1]} : vector<2x10x32xf32> to vector<2x10x8xf32>
    %28 = vector.extract_strided_slice %26 {offsets = [0, 0, 8], sizes = [2, 10, 8], strides = [1, 1, 1]} : vector<2x10x32xf32> to vector<2x10x8xf32>
    %29 = vector.extract_strided_slice %26 {offsets = [0, 0, 16], sizes = [2, 10, 8], strides = [1, 1, 1]} : vector<2x10x32xf32> to vector<2x10x8xf32>
    %30 = vector.extract_strided_slice %26 {offsets = [0, 0, 24], sizes = [2, 10, 8], strides = [1, 1, 1]} : vector<2x10x32xf32> to vector<2x10x8xf32>
    %31 = tpu.concatenate %27, %28, %29, %30 in 0 : vector<2x10x8xf32>, vector<2x10x8xf32>, vector<2x10x8xf32>, vector<2x10x8xf32> -> vector<8x10x8xf32>
    %32 = vector.extract_strided_slice %17 {offsets = [0, 64], sizes = [20, 32], strides = [1, 1]} : vector<20x96xf32> to vector<20x32xf32>
    %33 = vector.shape_cast %32 : vector<20x32xf32> to vector<2x10x32xf32>
    %34 = vector.extract_strided_slice %33 {offsets = [0, 0, 0], sizes = [2, 10, 8], strides = [1, 1, 1]} : vector<2x10x32xf32> to vector<2x10x8xf32>
    %35 = vector.extract_strided_slice %33 {offsets = [0, 0, 8], sizes = [2, 10, 8], strides = [1, 1, 1]} : vector<2x10x32xf32> to vector<2x10x8xf32>
    %36 = vector.extract_strided_slice %33 {offsets = [0, 0, 16], sizes = [2, 10, 8], strides = [1, 1, 1]} : vector<2x10x32xf32> to vector<2x10x8xf32>
    %37 = vector.extract_strided_slice %33 {offsets = [0, 0, 24], sizes = [2, 10, 8], strides = [1, 1, 1]} : vector<2x10x32xf32> to vector<2x10x8xf32>
    %38 = tpu.concatenate %34, %35, %36, %37 in 0 : vector<2x10x8xf32>, vector<2x10x8xf32>, vector<2x10x8xf32>, vector<2x10x8xf32> -> vector<8x10x8xf32>
    "tpu.trace_start"() <{level = 10 : i32, message = "bqd,bkd->bqk"}> : () -> ()
    %cst_5 = arith.constant dense<0.000000e+00> : vector<8x10x10xf32>
    %39 = tpu.matmul %24, %31, %cst_5 {dimension_numbers = #tpu.dot_dimension_numbers<[2], [2], [1], [1], [0, 0, 0, 1, 1, 1], [0], [0]>} : vector<8x10x8xf32>, vector<8x10x8xf32>, vector<8x10x10xf32> -> vector<8x10x10xf32>
    "tpu.trace_stop"() : () -> ()
    %cst_6 = arith.constant dense<0xFF800000> : vector<8x10xf32>
    %40 = vector.multi_reduction <maximumf>, %39, %cst_6 [2] : vector<8x10x10xf32> to vector<8x10xf32>
    %41 = vector.shape_cast %40 : vector<8x10xf32> to vector<8x10x1xf32>
    %42 = vector.broadcast %41 : vector<8x10x1xf32> to vector<8x10x10xf32>
    %43 = arith.subf %39, %42 : vector<8x10x10xf32>
    %44 = math.exp %43 : vector<8x10x10xf32>
    %cst_7 = arith.constant dense<0.000000e+00> : vector<8x10xf32>
    %45 = vector.multi_reduction <add>, %44, %cst_7 [2] : vector<8x10x10xf32> to vector<8x10xf32>
    %46 = vector.shape_cast %45 : vector<8x10xf32> to vector<8x10x1xf32>
    %47 = tpu.reciprocal %46 {approx = true} : vector<8x10x1xf32> -> vector<8x10x1xf32>
    %48 = vector.broadcast %47 : vector<8x10x1xf32> to vector<8x10x10xf32>
    %49 = arith.mulf %44, %48 : vector<8x10x10xf32>
    "tpu.trace_start"() <{level = 10 : i32, message = "bqk,bkd->bqd"}> : () -> ()
    %cst_8 = arith.constant dense<0.000000e+00> : vector<8x10x8xf32>
    %50 = tpu.matmul %49, %38, %cst_8 {dimension_numbers = #tpu.dot_dimension_numbers<[2], [1], [1], [2], [0, 0, 0, 1, 1, 2], [0], [0]>} : vector<8x10x10xf32>, vector<8x10x8xf32>, vector<8x10x8xf32> -> vector<8x10x8xf32>
    "tpu.trace_stop"() : () -> ()
    %51 = vector.extract_strided_slice %50 {offsets = [0, 0, 0], sizes = [2, 10, 8], strides = [1, 1, 1]} : vector<8x10x8xf32> to vector<2x10x8xf32>
    %52 = vector.extract_strided_slice %50 {offsets = [2, 0, 0], sizes = [2, 10, 8], strides = [1, 1, 1]} : vector<8x10x8xf32> to vector<2x10x8xf32>
    %53 = vector.extract_strided_slice %50 {offsets = [4, 0, 0], sizes = [2, 10, 8], strides = [1, 1, 1]} : vector<8x10x8xf32> to vector<2x10x8xf32>
    %54 = vector.extract_strided_slice %50 {offsets = [6, 0, 0], sizes = [2, 10, 8], strides = [1, 1, 1]} : vector<8x10x8xf32> to vector<2x10x8xf32>
    %55 = tpu.concatenate %51, %52, %53, %54 in 2 : vector<2x10x8xf32>, vector<2x10x8xf32>, vector<2x10x8xf32>, vector<2x10x8xf32> -> vector<2x10x32xf32>
    %56 = vector.shape_cast %55 : vector<2x10x32xf32> to vector<20x32xf32>
    %cst_9 = arith.constant dense<0.000000e+00> : vector<20x32xf32>
    %57 = tpu.matmul %56, %3, %cst_9 {dimension_numbers = #tpu.dot_dimension_numbers<[1], [0], [0], [1], [0, 0, 1, 1], [], []>} : vector<20x32xf32>, vector<32x32xf32>, vector<20x32xf32> -> vector<20x32xf32>
    %58 = vector.broadcast %8 : vector<1x32xf32> to vector<20x32xf32>
    %59 = arith.addf %57, %58 : vector<20x32xf32>
    %60 = arith.addf %0, %59 : vector<20x32xf32>
    %cst_10 = arith.constant dense<0.000000e+00> : vector<20xf32>
    %61 = vector.multi_reduction <add>, %60, %cst_10 [1] : vector<20x32xf32> to vector<20xf32>
    %62 = vector.shape_cast %61 : vector<20xf32> to vector<20x1xf32>
    %cst_11 = arith.constant 3.200000e+01 : f32
    %63 = vector.broadcast %cst_11 : f32 to vector<20x1xf32>
    %64 = arith.divf %62, %63 : vector<20x1xf32>
    %65 = vector.broadcast %64 : vector<20x1xf32> to vector<20x32xf32>
    %66 = arith.subf %60, %65 : vector<20x32xf32>
    %67 = vector.broadcast %64 : vector<20x1xf32> to vector<20x32xf32>
    %68 = arith.subf %60, %67 : vector<20x32xf32>
    %69 = arith.mulf %66, %68 : vector<20x32xf32>
    %cst_12 = arith.constant dense<0.000000e+00> : vector<20xf32>
    %70 = vector.multi_reduction <add>, %69, %cst_12 [1] : vector<20x32xf32> to vector<20xf32>
    %71 = vector.shape_cast %70 : vector<20xf32> to vector<20x1xf32>
    %cst_13 = arith.constant 3.200000e+01 : f32
    %72 = vector.broadcast %cst_13 : f32 to vector<20x1xf32>
    %73 = arith.divf %71, %72 : vector<20x1xf32>
    %cst_14 = arith.constant 9.99999974E-6 : f32
    %74 = vector.broadcast %cst_14 : f32 to vector<20x1xf32>
    %75 = arith.addf %73, %74 : vector<20x1xf32>
    %76 = math.rsqrt %75 : vector<20x1xf32>
    %77 = vector.broadcast %64 : vector<20x1xf32> to vector<20x32xf32>
    %78 = arith.subf %60, %77 : vector<20x32xf32>
    %79 = vector.broadcast %76 : vector<20x1xf32> to vector<20x32xf32>
    %80 = arith.mulf %78, %79 : vector<20x32xf32>
    %81 = vector.broadcast %11 : vector<1x32xf32> to vector<20x32xf32>
    %82 = arith.mulf %80, %81 : vector<20x32xf32>
    %83 = vector.broadcast %12 : vector<1x32xf32> to vector<20x32xf32>
    %84 = arith.addf %82, %83 : vector<20x32xf32>
    %cst_15 = arith.constant dense<0.000000e+00> : vector<20x64xf32>
    %85 = tpu.matmul %84, %4, %cst_15 {dimension_numbers = #tpu.dot_dimension_numbers<[1], [0], [0], [1], [0, 0, 1, 1], [], []>} : vector<20x32xf32>, vector<32x64xf32>, vector<20x64xf32> -> vector<20x64xf32>
    %86 = vector.broadcast %9 : vector<1x64xf32> to vector<20x64xf32>
    %87 = arith.addf %85, %86 : vector<20x64xf32>
    %cst_16 = arith.constant 0.000000e+00 : f32
    %88 = vector.broadcast %cst_16 : f32 to vector<20x64xf32>
    %89 = arith.maximumf %87, %88 : vector<20x64xf32>
    %cst_17 = arith.constant dense<0.000000e+00> : vector<20x32xf32>
    %90 = tpu.matmul %89, %5, %cst_17 {dimension_numbers = #tpu.dot_dimension_numbers<[1], [1], [0], [0], [0, 0, 1, 0], [], []>} : vector<20x64xf32>, vector<32x64xf32>, vector<20x32xf32> -> vector<20x32xf32>
    %91 = vector.broadcast %10 : vector<1x32xf32> to vector<20x32xf32>
    %92 = arith.addf %90, %91 : vector<20x32xf32>
    %93 = arith.addf %84, %92 : vector<20x32xf32>
    %cst_18 = arith.constant dense<0.000000e+00> : vector<20xf32>
    %94 = vector.multi_reduction <add>, %93, %cst_18 [1] : vector<20x32xf32> to vector<20xf32>
    %95 = vector.shape_cast %94 : vector<20xf32> to vector<20x1xf32>
    %cst_19 = arith.constant 3.200000e+01 : f32
    %96 = vector.broadcast %cst_19 : f32 to vector<20x1xf32>
    %97 = arith.divf %95, %96 : vector<20x1xf32>
    %98 = vector.broadcast %97 : vector<20x1xf32> to vector<20x32xf32>
    %99 = arith.subf %93, %98 : vector<20x32xf32>
    %100 = vector.broadcast %97 : vector<20x1xf32> to vector<20x32xf32>
    %101 = arith.subf %93, %100 : vector<20x32xf32>
    %102 = arith.mulf %99, %101 : vector<20x32xf32>
    %cst_20 = arith.constant dense<0.000000e+00> : vector<20xf32>
    %103 = vector.multi_reduction <add>, %102, %cst_20 [1] : vector<20x32xf32> to vector<20xf32>
    %104 = vector.shape_cast %103 : vector<20xf32> to vector<20x1xf32>
    %cst_21 = arith.constant 3.200000e+01 : f32
    %105 = vector.broadcast %cst_21 : f32 to vector<20x1xf32>
    %106 = arith.divf %104, %105 : vector<20x1xf32>
    %cst_22 = arith.constant 9.99999974E-6 : f32
    %107 = vector.broadcast %cst_22 : f32 to vector<20x1xf32>
    %108 = arith.addf %106, %107 : vector<20x1xf32>
    %109 = math.rsqrt %108 : vector<20x1xf32>
    %110 = vector.broadcast %97 : vector<20x1xf32> to vector<20x32xf32>
    %111 = arith.subf %93, %110 : vector<20x32xf32>
    %112 = vector.broadcast %109 : vector<20x1xf32> to vector<20x32xf32>
    %113 = arith.mulf %111, %112 : vector<20x32xf32>
    %114 = vector.broadcast %13 : vector<1x32xf32> to vector<20x32xf32>
    %115 = arith.mulf %113, %114 : vector<20x32xf32>
    %116 = vector.broadcast %14 : vector<1x32xf32> to vector<20x32xf32>
    %117 = arith.addf %115, %116 : vector<20x32xf32>
    %c0_23 = arith.constant 0 : index
    %c0_24 = arith.constant 0 : index
    %118 = vector.load %arg4[%c0_23, %c0_24] : memref<20x32xf32, #tpu.memory_space<vmem>>, vector<20x32xf32>
    tpu.vector_store %arg4[%c0_23, %c0_24], %117 {strides = array<i32>} : memref<20x32xf32, #tpu.memory_space<vmem>>, vector<20x32xf32>,
    return
  }
  func.func @transform_0(%arg0: i32) -> (i32, i32) {
    %c0_i32 = arith.constant 0 : i32
    %c0_i32_0 = arith.constant 0 : i32
    %c0_i32_1 = arith.constant 0 : i32
    return %c0_i32, %c0_i32_0 : i32, i32
  }
  func.func @transform_1(%arg0: i32) -> (i32, i32) {
    %c0_i32 = arith.constant 0 : i32
    %c0_i32_0 = arith.constant 0 : i32
    %c0_i32_1 = arith.constant 0 : i32
    return %c0_i32, %c0_i32_0 : i32, i32
  }
  func.func @transform_2(%arg0: i32) -> (i32, i32) {
    %c0_i32 = arith.constant 0 : i32
    %c0_i32_0 = arith.constant 0 : i32
    %c0_i32_1 = arith.constant 0 : i32
    return %c0_i32, %c0_i32_0 : i32, i32
  }
  func.func @transform_3(%arg0: i32) -> (i32, i32) {
    %c0_i32 = arith.constant 0 : i32
    %c0_i32_0 = arith.constant 0 : i32
    %c0_i32_1 = arith.constant 0 : i32
    return %c0_i32, %c0_i32_0 : i32, i32
  }
}

</mosaic_0001>

<bundles_post_ra>
// kernel: transformer_encoder_layer.1
= control target key start
LH: loop header
LB: loop body
LE: loop exit
PB: predicated region body
PF: predicated region fallthrough
CT: control target
= control target key end

     0   :  { %v3252_v0 = vmov 0.0|0.0   ;;  %vm3253_vm0 = vmmov 0   ;;  %v3254_v4 = vmov 0.0   ;;  %vm30_vm1 = vcmask 261120   ;;  %s3256_s28 = smov 112   ;;  %s3257_s29 = smov 120   ;;  %s3894_s1 = inlined_call_operand.vmem [shape: f32[32,256], index: 1, kind: input, shape index: {}]   ;;  %s3895_s0 = inlined_call_operand.vmem [shape: f32[20,32], index: 0, kind: input, shape index: {}]   ;;  %s3896_s2 = inlined_call_operand.vmem [shape: f32[8,128], index: 2, kind: input, shape index: {}]   ;;  %s3897_s3 = inlined_call_operand.vmem [shape: f32[20,32], index: 3, kind: output, shape index: {}]  }
   0x1   :  { %2934 = vmatprep.subr.bf16.mxu0 %v3252_v0  ;;  %v3290_v1 = vld [vmem:[%s3894_s1] sm:$0xff]  ;;  %v3295_v2 = vld [vmem:[%s3894_s1 + $0x10] sm:$0xff]  ;;  %2762 = vmatprep.mubr.msk.f32.mxu0 %vm3253_vm0, %v3254_v4  ;;  %v15_v10 = vld [vmem:[%s3895_s0 + $0x8] sm:$0xff]  ;;  %v26_v12 = vlaneseq  ;;  %v3255_v14 = vmov 1983009808   ;;  %s3258_s30 = smov 104  }
   0x2   :  { %v21_v3 = vld [vmem:[%s3894_s1 + $0x20] sm:$0xff]  ;;  %v3150_v5 = vpack.i.bf16 %v3295_v2, %v3290_v1  ;;  %v2935_v6 = vpack.c.bf16 %v3295_v2, %v3290_v1  ;;  %v23_v7 = vld [vmem:[%s3894_s1 + $0x30] sm:$0xff]  ;;  %v125_v15 = vunpack.c.l.s4 %v3255_v14  ;;  %vm253_vm2 = vcmask 64512   ;;  %s3259_s4 = smov 96   ;;  %s3260_s5 = smov 64  }
   0x3   :  { %v2938_v8 = vpack.c.bf16 %v23_v7, %v21_v3  ;;  %v14_v9 = vld [vmem:[%s3895_s0] sm:$0xff]  ;;  %v16_v11 = vld [vmem:[%s3895_s0 + $0x10] sm:$0xf]  ;;  %v3326_v13 = vshrl.u32 %v26_v12, 7  ;;  %vm3461_vm3 = vmpackc.low %vm253_vm2, %vm253_vm2  ;;  %vm1303_vm4 = vcmask 1041408   ;;  %vm3261_vm5 = vmmov 1  }
   0x4   :  { %2936 = vmatpush3.bf16.msra.mxu0 %v2935_v6  ;;  %v25_v17 = vld [vmem:[%s3896_s2] sm:$0xff]  ;;  %v126_v18 = vunpack.c.0.s8 %v125_v15  ;;  %vm3526_vm6 = vmpackc.low %vm1303_vm4, %vm3261_vm5  ;;  %vm1118_vm7 = vcmask 74752   ;;  %vm1114_vm8 = vcmask 80896   ;;  %s3262_s6 = smov 32   ;;  %s3263_s7 = smov 8   ;;  %vm2049_vm9 = vcmask 130048  }
   0x5   :  { %2937 = vmatprep.subr.bf16.mxu0 %v3252_v0  ;;  %v28_v16 = vsub.s32 0, %v3326_v13  ;;  %s3264_s8 = smov 16   ;;  %s3265_s9 = smov 24   ;;  %vm2054_vm10 = vcmask 195584   ;;  %vm2268_vm11 = vcmask 257024   ;;  %vm2429_vm12 = vcmask 523264  }
   0x6   :  { %v3333_v20 = vsub.s32 %v126_v18, %v3326_v13  ;;  %vm3845_vm13 = vmpackc.low %vm2429_vm12, %vm2429_vm12 }
   0x7   :  { %v29_v19 = vrot.slane %v25_v17, %v28_v16 }
   0x8   :  { %2939 = vmatpush3.bf16.msra.mxu0 %v2938_v8 }
   0xb   :  { %2763 = vmatmul.mubr.msk.f32.vlgmr.msra.gmra.mrb[0].mxu0 %vm30_vm1, %v14_v9 }
   0xc   :  { %2765 = vmatprep.mubr.msk.f32.mxu0 %vm3253_vm0, %v3254_v4 }
   0xf   :  { %2766 = vmatmul.mubr.msk.f32.gmra.mrb[2].mxu0 %vm30_vm1, %v15_v10 }
  0x10   :  { %2768 = vmatprep.mubr.msk.f32.mxu0 %vm3253_vm0, %v3254_v4 }
  0x13   :  { %2769 = vmatmul.mubr.msk.f32.gmra.mrb[4].mxu0 %vm30_vm1, %v16_v11 }
  0xde   :  { %v106_v21 = vpop.f32.mrb[0].mxu0 }
  0xdf   :  { %v107_v22 = vadd.f32 %v106_v21, %v29_v19  ;;  %v2764_v23 = vpop.f32.mrb[1].mxu0 }
  0xe1   :  { %v123_v24 = vcombine.high %v107_v22, %v107_v22  ;;  %v130_v25 = vrot.slane %v107_v22, %v3333_v20 }
  0xe2   :  { %v111_v26 = vpop.f32.mrb[2].mxu0 }
  0xe3   :  { %v137_v27 = vrot.slane %v123_v24, %v3333_v20  ;;  %185 = vrot.lane.b32.xlu1 %v130_v25, %s3256_s28  ;;  %165 = vrot.lane.b32.xlu0 %v130_v25, %s3257_s29  ;;  %v112_v28 = vadd.f32 %v111_v26, %v29_v19  ;;  %v138_v29 = vcombine.high %v130_v25, %v130_v25  ;;  %v2767_v30 = vpop.f32.mrb[3].mxu0 }
  0xe5   :  { %v139_v31 = vcombine.high %v137_v27, %v137_v27  ;;  %v140_v32 = vcombine.high %v112_v28, %v112_v28  ;;  %v225_v33 = vcombine.low %v130_v25, %v138_v29  ;;  %v147_v34 = vrot.slane %v112_v28, %v3333_v20 }
  0xe6   :  { %v116_v35 = vpop.f32.mrb[4].mxu0 }
  0xe7   :  { %v154_v36 = vrot.slane %v140_v32, %v3333_v20  ;;  %205 = vrot.lane.b32.xlu1 %v130_v25, %s3258_s30  ;;  %167 = vrot.lane.b32.xlu0 %v138_v29, %s3257_s29  ;;  %v226_v37 = vcombine.low %v137_v27, %v139_v31  ;;  %v2770_v38 = vpop.f32.mrb[5].mxu0  ;;  %v117_v39 = vadd.f32 %v116_v35, %v29_v19 }
  0xe8   :  { %v155_v40 = vcombine.high %v147_v34, %v147_v34  ;;  %v233_v41 = vrot.slane %v225_v33, %v3333_v20  ;;  %v3375_v52 = vrot.slane %v147_v34, %v3333_v20 }
  0xe9   :  { %v240_v42 = vrot.slane %v226_v37, %v3333_v20  ;;  %v156_v43 = vcombine.high %v154_v36, %v154_v36  ;;  %v163_v44 = vrot.slane %v117_v39, %v3333_v20 }
  0xea   :  { %v337_v45 = vcombine.low %v155_v40, %v154_v36 }
  0xeb   :  { %187 = vrot.lane.b32.xlu0 %v138_v29, %s3256_s28  ;;  %169 = vrot.lane.b32.xlu1 %v137_v27, %s3257_s29  ;;  %v241_v46 = vcombine.low %v233_v41, %v240_v42  ;;  %v338_v47 = vcombine.low %v156_v43, %v163_v44  ;;  %v164_v51 = vcombine.high %v163_v44, %v163_v44 }
  0xec   :  { %v345_v48 = vrot.slane %v337_v45, %v3333_v20 }
  0xed   :  { %2775 = vmatprep.mubr.msk.f32.mxu0 %vm253_vm2, %v241_v46  ;;  %v352_v49 = vrot.slane %v338_v47, %v3333_v20  ;;  %v3378_v53 = vrot.slane %v164_v51, %v3333_v20  ;;  %v3383_v54 = vpack.i.bf16 %v3375_v52, %v241_v46 }
  0xef   :  { %207 = vrot.lane.b32.xlu0 %v138_v29, %s3258_s30  ;;  %189 = vrot.lane.b32.xlu1 %v137_v27, %s3256_s28  ;;  %v353_v50 = vcombine.low %v345_v48, %v352_v49 }
  0xf1   :  { %2782 = vmatprep.mubr.msk.f32.mxu1 %vm253_vm2, %v353_v50  ;;  %v3386_v55 = vpack.i.bf16 %v3378_v53, %v353_v50 }
  0xf3   :  { %209 = vrot.lane.b32.xlu1 %v137_v27, %s3258_s30  ;;  %173 = vrot.lane.b32.xlu0 %v147_v34, %s3257_s29 }
  0xf7   :  { %171 = vrot.lane.b32.xlu1 %v139_v31, %s3257_s29  ;;  %191 = vrot.lane.b32.xlu0 %v139_v31, %s3256_s28 }
  0xfb   :  { %193 = vrot.lane.b32.xlu0 %v147_v34, %s3256_s28  ;;  %175 = vrot.lane.b32.xlu1 %v155_v40, %s3257_s29 }
  0xff   :  { %211 = vrot.lane.b32.xlu0 %v139_v31, %s3258_s30  ;;  %195 = vrot.lane.b32.xlu1 %v155_v40, %s3256_s28 }
 0x103   :  { %177 = vrot.lane.b32.xlu0 %v154_v36, %s3257_s29  ;;  %179 = vrot.lane.b32.xlu1 %v156_v43, %s3257_s29 }
 0x107   :  { %197 = vrot.lane.b32.xlu0 %v154_v36, %s3256_s28  ;;  %199 = vrot.lane.b32.xlu1 %v156_v43, %s3256_s28 }
 0x10b   :  { %181 = vrot.lane.b32.xlu0 %v163_v44, %s3257_s29  ;;  %183 = vrot.lane.b32.xlu1 %v164_v51, %s3257_s29 }
 0x10f   :  { %213 = vrot.lane.b32.xlu0 %v147_v34, %s3258_s30  ;;  %215 = vrot.lane.b32.xlu1 %v155_v40, %s3258_s30 }
 0x113   :  { %201 = vrot.lane.b32.xlu0 %v163_v44, %s3256_s28  ;;  %203 = vrot.lane.b32.xlu1 %v164_v51, %s3256_s28 }
 0x117   :  { %217 = vrot.lane.b32.xlu0 %v154_v36, %s3258_s30  ;;  %219 = vrot.lane.b32.xlu1 %v156_v43, %s3258_s30 }
 0x11b   :  { %221 = vrot.lane.b32.xlu0 %v163_v44, %s3258_s30  ;;  %223 = vrot.lane.b32.xlu1 %v164_v51, %s3258_s30 }
 0x11f   :  { %3071 = vrot.lane.b32.xlu0 %v3383_v54, %s3259_s4  ;;  %3076 = vrot.lane.b32.xlu1 %v3386_v55, %s3259_s4 }
 0x155   :  { %v186_v56 = vpop.permute.xlu1 %185  ;;  %v166_v57 = vpop.permute.xlu0 %165 }
 0x159   :  { %v206_v58 = vpop.permute.xlu1 %205  ;;  %v168_v59 = vpop.permute.xlu0 %167 }
 0x15a   :  { %v448_v7 = vcombine.low %v166_v57, %v168_v59 }
 0x15c   :  { %v456_v14 = vrot.slane %v448_v7, %v3333_v20 }
 0x15d   :  { %v188_v60 = vpop.permute.xlu0 %187  ;;  %v170_v61 = vpop.permute.xlu1 %169 }
 0x15e   :  { %v670_v10 = vcombine.low %v186_v56, %v188_v60 }
 0x160   :  { %v678_v19 = vrot.slane %v670_v10, %v3333_v20 }
 0x161   :  { %v208_v62 = vpop.permute.xlu0 %207  ;;  %v190_v63 = vpop.permute.xlu1 %189 }
 0x162   :  { %v892_v34 = vcombine.low %v206_v58, %v208_v62 }
 0x164   :  { %v900_v40 = vrot.slane %v892_v34, %v3333_v20 }
 0x165   :  { %v210_v3 = vpop.permute.xlu1 %209  ;;  %v174_v6 = vpop.permute.xlu0 %173 }
 0x166   :  { %v3397_v21 = vrot.slane %v174_v6, %v3333_v20 }
 0x169   :  { %v172_v8 = vpop.permute.xlu1 %171  ;;  %v192_v9 = vpop.permute.xlu0 %191 }
 0x16a   :  { %v449_v11 = vcombine.low %v170_v61, %v172_v8  ;;  %v671_v12 = vcombine.low %v190_v63, %v192_v9 }
 0x16c   :  { %v463_v15 = vrot.slane %v449_v11, %v3333_v20  ;;  %v685_v16 = vrot.slane %v671_v12, %v3333_v20 }
 0x16d   :  { %v194_v17 = vpop.permute.xlu0 %193  ;;  %v176_v18 = vpop.permute.xlu1 %175 }
 0x16e   :  { %v3399_v22 = vcombine.low %v456_v14, %v463_v15  ;;  %v3401_v23 = vcombine.low %v678_v19, %v685_v16  ;;  %v3404_v24 = vrot.slane %v194_v17, %v3333_v20 }
 0x170   :  { %v3080_v25 = vpack.i.bf16 %v3397_v21, %v3399_v22  ;;  %v3411_v28 = vpack.i.bf16 %v3404_v24, %v3401_v23 }
 0x171   :  { %v212_v26 = vpop.permute.xlu0 %211  ;;  %v196_v27 = vpop.permute.xlu1 %195 }
 0x172   :  { %3081 = vrot.lane.b32.xlu0 %v3080_v25, %s3259_s4  ;;  %v893_v33 = vcombine.low %v210_v3, %v212_v26 }
 0x174   :  { %v907_v38 = vrot.slane %v893_v33, %v3333_v20 }
 0x175   :  { %v178_v29 = vpop.permute.xlu0 %177  ;;  %v180_v30 = vpop.permute.xlu1 %179 }
 0x176   :  { %3091 = vrot.lane.b32.xlu0 %v3411_v28, %s3259_s4  ;;  %v559_v35 = vcombine.low %v176_v18, %v178_v29  ;;  %v3419_v45 = vcombine.low %v900_v40, %v907_v38 }
 0x178   :  { %v567_v41 = vrot.slane %v559_v35, %v3333_v20 }
 0x179   :  { %v198_v31 = vpop.permute.xlu0 %197  ;;  %v200_v32 = vpop.permute.xlu1 %199 }
 0x17a   :  { %v781_v49 = vcombine.low %v196_v27, %v198_v31 }
 0x17c   :  { %v789_v59 = vrot.slane %v781_v49, %v3333_v20 }
 0x17d   :  { %v182_v36 = vpop.permute.xlu0 %181  ;;  %v184_v37 = vpop.permute.xlu1 %183 }
 0x17e   :  { %v560_v39 = vcombine.low %v180_v30, %v182_v36  ;;  %v3422_v47 = vrot.slane %v184_v37, %v3333_v20 }
 0x180   :  { %v574_v42 = vrot.slane %v560_v39, %v3333_v20 }
 0x181   :  { %v214_v43 = vpop.permute.xlu0 %213  ;;  %v216_v44 = vpop.permute.xlu1 %215 }
 0x182   :  { %v575_v46 = vcombine.low %v567_v41, %v574_v42  ;;  %v3425_v48 = vrot.slane %v214_v43, %v3333_v20 }
 0x184   :  { %v3429_v50 = vpack.i.bf16 %v3425_v48, %v3419_v45  ;;  %v3432_v51 = vpack.i.bf16 %v3422_v47, %v575_v46 }
 0x185   :  { %v202_v56 = vpop.permute.xlu0 %201  ;;  %v204_v57 = vpop.permute.xlu1 %203 }
 0x186   :  { %v782_v58 = vcombine.low %v200_v32, %v202_v56  ;;  %3101 = vrot.lane.b32.xlu0 %v3429_v50, %s3259_s4  ;;  %3086 = vrot.lane.b32.xlu1 %v3432_v51, %s3259_s4  ;;  %v3443_v3 = vrot.slane %v204_v57, %v3333_v20 }
 0x188   :  { %v796_v60 = vrot.slane %v782_v58, %v3333_v20 }
 0x189   :  { %v218_v61 = vpop.permute.xlu0 %217  ;;  %v220_v62 = vpop.permute.xlu1 %219 }
 0x18a   :  { %v3440_v63 = vcombine.low %v789_v59, %v796_v60  ;;  %3116 = vrot.lane.b32.xlu0 %v3080_v25, %s3260_s5  ;;  %v1003_v6 = vcombine.low %v216_v44, %v218_v61 }
 0x18c   :  { %v3448_v7 = vpack.i.bf16 %v3443_v3, %v3440_v63  ;;  %v1011_v11 = vrot.slane %v1003_v6, %v3333_v20 }
 0x18d   :  { %v222_v8 = vpop.permute.xlu0 %221  ;;  %v224_v9 = vpop.permute.xlu1 %223 }
 0x18e   :  { %v1004_v10 = vcombine.low %v220_v62, %v222_v8  ;;  %3096 = vrot.lane.b32.xlu1 %v3448_v7, %s3259_s4  ;;  %v3455_v14 = vrot.slane %v224_v9, %v3333_v20 }
 0x190   :  { %v1018_v12 = vrot.slane %v1004_v10, %v3333_v20 }
 0x191   :  { %v3072_v15 = vpop.permute.xlu0 %3071  ;;  %v3077_v16 = vpop.permute.xlu1 %3076 }
 0x192   :  { %v3457_v17 = vcombine.low %v1011_v11, %v1018_v12  ;;  %v3074_v18 = vunpack.i.h.bf16 %v3072_v15  ;;  %v3073_v19 = vunpack.i.l.bf16 %v3072_v15  ;;  %v3079_v25 = vunpack.i.h.bf16 %v3077_v16 }
 0x193   :  { %v3078_v26 = vunpack.i.l.bf16 %v3077_v16 }
 0x194   :  { %v2940_v29 = vpack.c.bf16 %v3074_v18, %v3073_v19  ;;  %v3467_v30 = vpack.i.bf16 %v3455_v14, %v3457_v17 }
 0x195   :  { %v2946_v31 = vpack.c.bf16 %v3079_v25, %v3078_v26 }
 0x196   :  { %2942 = vmatprep.subr.msk.bf16.mxu0 %vm3461_vm3, %v2940_v29  ;;  %3106 = vrot.lane.b32.xlu1 %v3467_v30, %s3259_s4 }
 0x197   :  { %2948 = vmatprep.subr.msk.bf16.mxu1 %vm3461_vm3, %v2946_v31  ;;  %2945 = vmatpush3.bf16.xpose.msk.msra.mxu0 %vm3461_vm3, %v2940_v29 }
 0x198   :  { %2951 = vmatpush3.bf16.xpose.msk.msra.mxu1 %vm3461_vm3, %v2946_v31 }
 0x19a   :  { %3111 = vrot.lane.b32.xlu1 %v3383_v54, %s3260_s5 }
 0x19e   :  { %2776 = vmatmul.mubr.msk.f32.vlgmr.msra.gmra.mrb[6].mxu0 %vm253_vm2, %v3375_v52  ;;  %3121 = vrot.lane.b32.xlu1 %v3386_v55, %s3260_s5 }
 0x19f   :  { %2783 = vmatmul.mubr.msk.f32.vlgmr.msra.gmra.mrb[0].mxu1 %vm253_vm2, %v3378_v53  ;;  %2789 = vmatprep.mubr.msk.f32.mxu0 %vm253_vm2, %v3399_v22 }
 0x1a0   :  { %2796 = vmatprep.mubr.msk.f32.mxu1 %vm253_vm2, %v575_v46 }
 0x1a2   :  { %3126 = vrot.lane.b32.xlu1 %v3411_v28, %s3260_s5 }
 0x1e4   :  { %v3082_v32 = vpop.permute.xlu0 %3081 }
 0x1e5   :  { %v3084_v33 = vunpack.i.h.bf16 %v3082_v32  ;;  %v3083_v54 = vunpack.i.l.bf16 %v3082_v32 }
 0x1e7   :  { %v2952_v34 = vpack.c.bf16 %v3084_v33, %v3083_v54 }
 0x1e8   :  { %v3092_v35 = vpop.permute.xlu0 %3091 }
 0x1e9   :  { %v3094_v52 = vunpack.i.h.bf16 %v3092_v35  ;;  %v3093_v36 = vunpack.i.l.bf16 %v3092_v35  ;;  %2954 = vmatprep.subr.msk.bf16.mxu0 %vm3461_vm3, %v2952_v34 }
 0x1ea   :  { %2957 = vmatpush3.bf16.xpose.msk.msra.mxu0 %vm3461_vm3, %v2952_v34 }
 0x1eb   :  { %v2964_v53 = vpack.c.bf16 %v3094_v52, %v3093_v36 }
 0x1ed   :  { %2966 = vmatprep.subr.msk.bf16.mxu0 %vm3461_vm3, %v2964_v53 }
 0x1f1   :  { %2790 = vmatmul.mubr.msk.f32.vlgmr.msra.gmra.mrb[8].mxu0 %vm253_vm2, %v3397_v21 }
 0x1f2   :  { %2969 = vmatpush3.bf16.xpose.msk.msra.mxu0 %vm3461_vm3, %v2964_v53  ;;  %2803 = vmatprep.mubr.msk.f32.mxu0 %vm253_vm2, %v3401_v23 }
 0x1f8   :  { %v3102_v55 = vpop.permute.xlu0 %3101  ;;  %v3087_v22 = vpop.permute.xlu1 %3086 }
 0x1f9   :  { %v3104_v28 = vunpack.i.h.bf16 %v3102_v55  ;;  %v3103_v37 = vunpack.i.l.bf16 %v3102_v55  ;;  %v3089_v38 = vunpack.i.h.bf16 %v3087_v22  ;;  %v3088_v39 = vunpack.i.l.bf16 %v3087_v22  ;;  %2804 = vmatmul.mubr.msk.f32.vlgmr.msra.gmra.mrb[10].mxu0 %vm253_vm2, %v3404_v24 }
 0x1fa   :  { %2817 = vmatprep.mubr.msk.f32.mxu0 %vm253_vm2, %v3419_v45 }
 0x1fb   :  { %v2976_v40 = vpack.c.bf16 %v3104_v28, %v3103_v37  ;;  %v2958_v21 = vpack.c.bf16 %v3089_v38, %v3088_v39 }
 0x1fc   :  { %v3117_v43 = vpop.permute.xlu0 %3116 }
 0x1fd   :  { %2960 = vmatprep.subr.msk.bf16.mxu1 %vm3461_vm3, %v2958_v21  ;;  %2978 = vmatprep.subr.msk.bf16.mxu0 %vm3461_vm3, %v2976_v40  ;;  %v3119_v45 = vunpack.i.h.bf16 %v3117_v43  ;;  %v3118_v46 = vunpack.i.l.bf16 %v3117_v43 }
 0x1fe   :  { %2963 = vmatpush3.bf16.xpose.msk.msra.mxu1 %vm3461_vm3, %v2958_v21  ;;  %2981 = vmatpush3.bf16.xpose.msk.msra.mxu0 %vm3461_vm3, %v2976_v40 }
 0x200   :  { %v3097_v23 = vpop.permute.xlu1 %3096 }
 0x201   :  { %v3099_v41 = vunpack.i.h.bf16 %v3097_v23  ;;  %v3098_v24 = vunpack.i.l.bf16 %v3097_v23 }
 0x203   :  { %v2970_v42 = vpack.c.bf16 %v3099_v41, %v3098_v24 }
 0x205   :  { %2797 = vmatmul.mubr.msk.f32.vlgmr.msra.gmra.mrb[2].mxu1 %vm253_vm2, %v3422_v47  ;;  %2972 = vmatprep.subr.msk.bf16.mxu1 %vm3461_vm3, %v2970_v42 }
 0x206   :  { %2818 = vmatmul.mubr.msk.f32.vlgmr.msra.gmra.mrb[12].mxu0 %vm253_vm2, %v3425_v48  ;;  %2975 = vmatpush3.bf16.xpose.msk.msra.mxu1 %vm3461_vm3, %v2970_v42  ;;  %v3000_v48 = vpack.c.bf16 %v3119_v45, %v3118_v46 }
 0x207   :  { %2810 = vmatprep.mubr.msk.f32.mxu1 %vm253_vm2, %v3440_v63 }
 0x208   :  { %v3107_v44 = vpop.permute.xlu1 %3106 }
 0x209   :  { %v3109_v49 = vunpack.i.h.bf16 %v3107_v44  ;;  %v3108_v56 = vunpack.i.l.bf16 %v3107_v44 }
 0x20b   :  { %v2982_v47 = vpack.c.bf16 %v3109_v49, %v3108_v56 }
 0x20c   :  { %v3112_v57 = vpop.permute.xlu1 %3111 }
 0x20d   :  { %v3114_v59 = vunpack.i.h.bf16 %v3112_v57  ;;  %v3113_v60 = vunpack.i.l.bf16 %v3112_v57  ;;  %2811 = vmatmul.mubr.msk.f32.vlgmr.msra.gmra.mrb[4].mxu1 %vm253_vm2, %v3443_v3  ;;  %2984 = vmatprep.subr.msk.bf16.mxu1 %vm3461_vm3, %v2982_v47 }
 0x20e   :  { %2987 = vmatpush3.bf16.xpose.msk.msra.mxu1 %vm3461_vm3, %v2982_v47  ;;  %2824 = vmatprep.mubr.msk.f32.mxu1 %vm253_vm2, %v3457_v17 }
 0x20f   :  { %v2988_v61 = vpack.c.bf16 %v3114_v59, %v3113_v60  ;;  %3002 = vmatprep.subr.msk.bf16.mxu1 %vm3526_vm6, %v3000_v48 }
 0x210   :  { %v3122_v62 = vpop.permute.xlu1 %3121 }
 0x211   :  { %v3124_v63 = vunpack.i.h.bf16 %v3122_v62  ;;  %v3123_v6 = vunpack.i.l.bf16 %v3122_v62  ;;  %2990 = vmatprep.subr.msk.bf16.mxu0 %vm3526_vm6, %v2988_v61 }
 0x212   :  { %2993 = vmatpush3.bf16.msk.msra.mxu0 %vm3526_vm6, %v2988_v61 }
 0x213   :  { %v3544_v3 = vpack.c.bf16 %v3124_v63, %v3123_v6 }
 0x214   :  { %v3127_v8 = vpop.permute.xlu1 %3126 }
 0x215   :  { %v3129_v9 = vunpack.i.h.bf16 %v3127_v8  ;;  %v3128_v10 = vunpack.i.l.bf16 %v3127_v8  ;;  %2825 = vmatmul.mubr.msk.f32.vlgmr.msra.gmra.mrb[6].mxu1 %vm253_vm2, %v3455_v14  ;;  %2996 = vmatprep.subr.msk.bf16.mxu0 %vm3526_vm6, %v3544_v3 }
 0x216   :  { %3005 = vmatpush3.bf16.msk.msra.mxu1 %vm3526_vm6, %v3000_v48 }
 0x217   :  { %v3553_v11 = vpack.c.bf16 %v3129_v9, %v3128_v10 }
 0x219   :  { %3014 = vmatprep.subr.msk.bf16.mxu1 %vm3526_vm6, %v3553_v11 }
 0x271   :  { %v2777_v12 = vpop.f32.mrb[6].mxu0 }
 0x272   :  { %v2784_v15 = vpop.f32.mrb[0].mxu1  ;;  %v328_v16 = vpop.f32.mrb[7].mxu0  ;;  %v1119_v14 = vsel %vm1118_vm7, %v2777_v12, -inf }
 0x273   :  { %v439_v17 = vpop.f32.mrb[1].mxu1  ;;  %1120 = vmax.xlane.f32.xlu1 %v1119_v14  ;;  %v1115_v18 = vsel %vm1114_vm8, %v328_v16, -inf  ;;  %v1125_v25 = vsel %vm1118_vm7, %v2784_v15, -inf }
 0x274   :  { %1116 = vmax.xlane.f32.xlu0 %v1115_v18  ;;  %v1122_v19 = vsel %vm1114_vm8, %v439_v17, -inf }
 0x277   :  { %1123 = vmax.xlane.f32.xlu1 %v1122_v19 }
 0x278   :  { %1126 = vmax.xlane.f32.xlu0 %v1125_v25 }
 0x2c4   :  { %v3562_v26 = vpop.f32.mrb[8].mxu0 }
 0x2c5   :  { %v3564_v27 = vpop.f32.mrb[9].mxu0  ;;  %v1131_v29 = vsel %vm1118_vm7, %v3562_v26, -inf }
 0x2c6   :  { %1132 = vmax.xlane.f32.xlu0 %v1131_v29  ;;  %v1128_v31 = vsel %vm1114_vm8, %v3564_v27, -inf }
 0x2ca   :  { %1129 = vmax.xlane.f32.xlu0 %v1128_v31 }
 0x2cc   :  { %v3570_v32 = vpop.f32.mrb[10].mxu0 }
 0x2cd   :  { %v3572_v33 = vpop.f32.mrb[11].mxu0  ;;  %v1143_v55 = vsel %vm1118_vm7, %v3570_v32, -inf }
 0x2ce   :  { %v1140_v22 = vsel %vm1114_vm8, %v3572_v33, -inf }
 0x2d8   :  { %v3574_v54 = vpop.f32.mrb[2].mxu1 }
 0x2d9   :  { %v3576_v34 = vpop.f32.mrb[12].mxu0  ;;  %v3578_v35 = vpop.f32.mrb[3].mxu1  ;;  %v1137_v52 = vsel %vm1118_vm7, %v3574_v54, -inf }
 0x2da   :  { %v3582_v36 = vpop.f32.mrb[13].mxu0  ;;  %1138 = vmax.xlane.f32.xlu0 %v1137_v52  ;;  %v1134_v53 = vsel %vm1114_vm8, %v3578_v35, -inf  ;;  %v1155_v40 = vsel %vm1118_vm7, %v3576_v34, -inf }
 0x2db   :  { %1135 = vmax.xlane.f32.xlu1 %v1134_v53  ;;  %v1152_v21 = vsel %vm1114_vm8, %v3582_v36, -inf }
 0x2de   :  { %1144 = vmax.xlane.f32.xlu0 %v1143_v55 }
 0x2df   :  { %1141 = vmax.xlane.f32.xlu1 %v1140_v22 }
 0x2e0   :  { %v3590_v28 = vpop.f32.mrb[4].mxu1 }
 0x2e1   :  { %v3592_v37 = vpop.f32.mrb[5].mxu1  ;;  %v1149_v38 = vsel %vm1118_vm7, %v3590_v28, -inf }
 0x2e2   :  { %1150 = vmax.xlane.f32.xlu0 %v1149_v38  ;;  %v1146_v39 = vsel %vm1114_vm8, %v3592_v37, -inf }
 0x2e3   :  { %1147 = vmax.xlane.f32.xlu1 %v1146_v39 }
 0x2e6   :  { %1156 = vmax.xlane.f32.xlu0 %v1155_v40 }
 0x2e7   :  { %1153 = vmax.xlane.f32.xlu1 %v1152_v21 }
 0x2e8   :  { %v3602_v23 = vpop.f32.mrb[6].mxu1 }
 0x2e9   :  { %v3604_v41 = vpop.f32.mrb[7].mxu1  ;;  %v1161_v24 = vsel %vm1118_vm7, %v3602_v23, -inf }
 0x2ea   :  { %1162 = vmax.xlane.f32.xlu0 %v1161_v24  ;;  %v1158_v42 = vsel %vm1114_vm8, %v3604_v41, -inf }
 0x2eb   :  { %1159 = vmax.xlane.f32.xlu1 %v1158_v42 }
 0x2fc   :  { %3136 = vrot.lane.b32.xlu1 %v3429_v50, %s3260_s5 }
 0x300   :  { %3131 = vrot.lane.b32.xlu0 %v3432_v51, %s3260_s5  ;;  %v1121_v44 = vpop.xlane.xlu1 %1120 }
 0x301   :  { %v1117_v43 = vpop.xlane.xlu0 %1116  ;;  %v1165_v45 = vsub.f32 %v2777_v12, %v1121_v44 }
 0x302   :  { %v1164_v46 = vsub.f32 %v328_v16, %v1117_v43 }
 0x303   :  { %v1182_v47 = vmul.f32 1.442695, %v1165_v45 }
 0x304   :  { %v1124_v56 = vpop.xlane.xlu1 %1123  ;;  %v1180_v48 = vmul.f32 1.442695, %v1164_v46 }
 0x305   :  { %v1127_v49 = vpop.xlane.xlu0 %1126  ;;  %v1166_v59 = vsub.f32 %v439_v17, %v1124_v56  ;;  %3170 = vpow2.f32 %v1182_v47 }
 0x306   :  { %v1167_v57 = vsub.f32 %v2784_v15, %v1127_v49  ;;  %3172 = vpow2.f32 %v1180_v48 }
 0x307   :  { %v1184_v61 = vmul.f32 1.442695, %v1166_v59 }
 0x308   :  { %v1186_v60 = vmul.f32 1.442695, %v1167_v57 }
 0x30a   :  { %3174 = vpow2.f32 %v1186_v60 }
 0x30b   :  { %3176 = vpow2.f32 %v1184_v61 }
 0x30f   :  { %v3614_v50 = vpop.eup %3170 }
 0x310   :  { %v3616_v62 = vpop.eup %3172  ;;  %v1215_v51 = vsel %vm1118_vm7, %v3614_v50, 0.0 }
 0x311   :  { %v1212_v6 = vsel %vm1114_vm8, %v3616_v62, 0.0 }
 0x314   :  { %v3620_v63 = vpop.eup %3174 }
 0x315   :  { %v3624_v8 = vpop.eup %3176  ;;  %v1221_v9 = vsel %vm1118_vm7, %v3620_v63, 0.0 }
 0x316   :  { %v1218_v10 = vsel %vm1114_vm8, %v3624_v8, 0.0 }
 0x31f   :  { %1216 = vadd.xlane.f32.xlu0 %v1215_v51 }
 0x320   :  { %1213 = vadd.xlane.f32.xlu1 %v1212_v6 }
 0x323   :  { %1222 = vadd.xlane.f32.xlu0 %v1221_v9 }
 0x324   :  { %1219 = vadd.xlane.f32.xlu1 %v1218_v10 }
 0x353   :  { %v1133_v12 = vpop.xlane.xlu0 %1132 }
 0x354   :  { %v1169_v15 = vsub.f32 %v3562_v26, %v1133_v12 }
 0x356   :  { %v1190_v16 = vmul.f32 1.442695, %v1169_v15 }
 0x357   :  { %v1130_v14 = vpop.xlane.xlu0 %1129 }
 0x358   :  { %3178 = vpow2.f32 %v1190_v16  ;;  %v1168_v17 = vsub.f32 %v3564_v27, %v1130_v14 }
 0x35a   :  { %v1188_v18 = vmul.f32 1.442695, %v1168_v17 }
 0x35c   :  { %3180 = vpow2.f32 %v1188_v18 }
 0x362   :  { %v3632_v19 = vpop.eup %3178 }
 0x363   :  { %v1227_v25 = vsel %vm1118_vm7, %v3632_v19, 0.0 }
 0x364   :  { %1228 = vadd.xlane.f32.xlu0 %v1227_v25 }
 0x366   :  { %v3636_v29 = vpop.eup %3180 }
 0x367   :  { %v1139_v31 = vpop.xlane.xlu0 %1138  ;;  %v1224_v52 = vsel %vm1114_vm8, %v3636_v29, 0.0 }
 0x368   :  { %v1171_v26 = vsub.f32 %v3574_v54, %v1139_v31  ;;  %v1136_v53 = vpop.xlane.xlu1 %1135  ;;  %1225 = vadd.xlane.f32.xlu1 %v1224_v52 }
 0x369   :  { %v1170_v27 = vsub.f32 %v3578_v35, %v1136_v53 }
 0x36a   :  { %v1194_v55 = vmul.f32 1.442695, %v1171_v26 }
 0x36b   :  { %v1192_v22 = vmul.f32 1.442695, %v1170_v27  ;;  %v1145_v38 = vpop.xlane.xlu0 %1144 }
 0x36c   :  { %3182 = vpow2.f32 %v1194_v55  ;;  %v1173_v39 = vsub.f32 %v3570_v32, %v1145_v38  ;;  %v1142_v40 = vpop.xlane.xlu1 %1141 }
 0x36d   :  { %3184 = vpow2.f32 %v1192_v22  ;;  %v1172_v21 = vsub.f32 %v3572_v33, %v1142_v40 }
 0x36e   :  { %v1198_v24 = vmul.f32 1.442695, %v1173_v39 }
 0x36f   :  { %v1196_v42 = vmul.f32 1.442695, %v1172_v21  ;;  %v1151_v43 = vpop.xlane.xlu0 %1150 }
 0x370   :  { %3186 = vpow2.f32 %v1198_v24  ;;  %v1175_v54 = vsub.f32 %v3590_v28, %v1151_v43  ;;  %v1148_v44 = vpop.xlane.xlu1 %1147 }
 0x371   :  { %3188 = vpow2.f32 %v1196_v42  ;;  %v1174_v35 = vsub.f32 %v3592_v37, %v1148_v44 }
 0x372   :  { %v1202_v45 = vmul.f32 1.442695, %v1175_v54 }
 0x373   :  { %v1200_v46 = vmul.f32 1.442695, %v1174_v35  ;;  %v1157_v49 = vpop.xlane.xlu0 %1156 }
 0x374   :  { %3190 = vpow2.f32 %v1202_v45  ;;  %v1177_v32 = vsub.f32 %v3576_v34, %v1157_v49  ;;  %v1154_v56 = vpop.xlane.xlu1 %1153 }
 0x375   :  { %3192 = vpow2.f32 %v1200_v46  ;;  %v1176_v33 = vsub.f32 %v3582_v36, %v1154_v56 }
 0x376   :  { %v3648_v47 = vpop.eup %3182  ;;  %v1206_v57 = vmul.f32 1.442695, %v1177_v32 }
 0x377   :  { %v3650_v48 = vpop.eup %3184  ;;  %v1204_v28 = vmul.f32 1.442695, %v1176_v33  ;;  %v1163_v59 = vpop.xlane.xlu0 %1162  ;;  %v1233_v37 = vsel %vm1118_vm7, %v3648_v47, 0.0 }
 0x378   :  { %3194 = vpow2.f32 %v1206_v57  ;;  %v1179_v60 = vsub.f32 %v3602_v23, %v1163_v59  ;;  %1234 = vadd.xlane.f32.xlu0 %v1233_v37  ;;  %v1160_v61 = vpop.xlane.xlu1 %1159  ;;  %v1230_v34 = vsel %vm1114_vm8, %v3650_v48, 0.0 }
 0x379   :  { %3196 = vpow2.f32 %v1204_v28  ;;  %v1178_v36 = vsub.f32 %v3604_v41, %v1160_v61  ;;  %1231 = vadd.xlane.f32.xlu1 %v1230_v34 }
 0x37a   :  { %v3658_v51 = vpop.eup %3186  ;;  %v1210_v6 = vmul.f32 1.442695, %v1179_v60 }
 0x37b   :  { %v3660_v9 = vpop.eup %3188  ;;  %v1208_v10 = vmul.f32 1.442695, %v1178_v36  ;;  %v1239_v12 = vsel %vm1118_vm7, %v3658_v51, 0.0  ;;  %v3132_v55 = vpop.permute.xlu0 %3131 }
 0x37c   :  { %3198 = vpow2.f32 %v1210_v6  ;;  %1240 = vadd.xlane.f32.xlu0 %v1239_v12  ;;  %v1236_v23 = vsel %vm1114_vm8, %v3660_v9, 0.0  ;;  %v3137_v22 = vpop.permute.xlu1 %3136  ;;  %v3134_v43 = vunpack.i.h.bf16 %v3132_v55  ;;  %v3133_v54 = vunpack.i.l.bf16 %v3132_v55 }
 0x37d   :  { %3200 = vpow2.f32 %v1208_v10  ;;  %1237 = vadd.xlane.f32.xlu1 %v1236_v23  ;;  %v3139_v56 = vunpack.i.h.bf16 %v3137_v22 }
 0x37e   :  { %v3666_v15 = vpop.eup %3190  ;;  %v3006_v45 = vpack.c.bf16 %v3134_v43, %v3133_v54 }
 0x37f   :  { %v3668_v41 = vpop.eup %3192  ;;  %v1245_v16 = vsel %vm1118_vm7, %v3666_v15, 0.0 }
 0x380   :  { %1246 = vadd.xlane.f32.xlu0 %v1245_v16  ;;  %v1242_v14 = vsel %vm1114_vm8, %v3668_v41, 0.0 }
 0x381   :  { %1243 = vadd.xlane.f32.xlu1 %v1242_v14 }
 0x382   :  { %v3674_v17 = vpop.eup %3194 }
 0x383   :  { %v3676_v18 = vpop.eup %3196  ;;  %v1251_v25 = vsel %vm1118_vm7, %v3674_v17, 0.0 }
 0x384   :  { %1252 = vadd.xlane.f32.xlu0 %v1251_v25  ;;  %v1248_v31 = vsel %vm1114_vm8, %v3676_v18, 0.0 }
 0x385   :  { %1249 = vadd.xlane.f32.xlu1 %v1248_v31 }
 0x386   :  { %v3682_v52 = vpop.eup %3198 }
 0x387   :  { %v3684_v26 = vpop.eup %3200  ;;  %v1257_v53 = vsel %vm1118_vm7, %v3682_v52, 0.0 }
 0x388   :  { %1258 = vadd.xlane.f32.xlu0 %v1257_v53  ;;  %v1254_v27 = vsel %vm1114_vm8, %v3684_v26, 0.0 }
 0x389   :  { %1255 = vadd.xlane.f32.xlu1 %v1254_v27 }
 0x39a   :  { %3146 = vrot.lane.b32.xlu1 %v3467_v30, %s3260_s5 }
 0x39e   :  { %3141 = vrot.lane.b32.xlu0 %v3448_v7, %s3260_s5 }
 0x3a2   :  { %3151 = vrot.lane.b32.xlu0 %v3150_v5, %s3262_s6 }
 0x3ac   :  { %v1217_v38 = vpop.xlane.xlu0 %1216 }
 0x3ad   :  { %3202 = vrcp.f32 %v1217_v38  ;;  %v1214_v39 = vpop.xlane.xlu1 %1213 }
 0x3ae   :  { %3204 = vrcp.f32 %v1214_v39 }
 0x3b0   :  { %v1223_v40 = vpop.xlane.xlu0 %1222 }
 0x3b1   :  { %3206 = vrcp.f32 %v1223_v40  ;;  %v1220_v21 = vpop.xlane.xlu1 %1219 }
 0x3b2   :  { %3208 = vrcp.f32 %v1220_v21 }
 0x3b7   :  { %v3203_v24 = vpop.eup %3202 }
 0x3b8   :  { %v3205_v42 = vpop.eup %3204  ;;  %v1277_v30 = vmul.f32 %v3203_v24, %v3614_v50 }
 0x3b9   :  { %v1276_v44 = vmul.f32 %v3205_v42, %v3616_v62 }
 0x3bb   :  { %v3207_v35 = vpop.eup %3206  ;;  %2831 = vmatprep.mubr.msk.f32.mxu0 %vm1114_vm8, %v1276_v44 }
 0x3bc   :  { %v3209_v7 = vpop.eup %3208  ;;  %2832 = vmatmul.mubr.msk.f32.vlgmr.msra.gmra.mrb[14].mxu0 %vm1114_vm8, %v1277_v30  ;;  %v1279_v49 = vmul.f32 %v3207_v35, %v3620_v63 }
 0x3bd   :  { %2999 = vmatpush3.bf16.msk.msra.mxu0 %vm3526_vm6, %v3544_v3  ;;  %v1278_v46 = vmul.f32 %v3209_v7, %v3624_v8  ;;  %v3138_v8 = vunpack.i.l.bf16 %v3137_v22 }
 0x3be   :  { %3008 = vmatprep.subr.msk.bf16.mxu0 %vm3526_vm6, %v3006_v45 }
 0x3bf   :  { %2838 = vmatprep.mubr.msk.f32.mxu0 %vm1114_vm8, %v1278_v46  ;;  %v3024_v57 = vpack.c.bf16 %v3139_v56, %v3138_v8 }
 0x3c0   :  { %2839 = vmatmul.mubr.msk.f32.vlgmr.msra.gmra.mrb[16].mxu0 %vm1114_vm8, %v1279_v49 }
 0x3c1   :  { %3011 = vmatpush3.bf16.msk.msra.mxu0 %vm3526_vm6, %v3006_v45 }
 0x3f1   :  { %v1229_v50 = vpop.xlane.xlu0 %1228 }
 0x3f2   :  { %3210 = vrcp.f32 %v1229_v50 }
 0x3f5   :  { %v1226_v62 = vpop.xlane.xlu1 %1225 }
 0x3f6   :  { %3212 = vrcp.f32 %v1226_v62 }
 0x3fc   :  { %v3211_v32 = vpop.eup %3210 }
 0x3fd   :  { %v1281_v33 = vmul.f32 %v3211_v32, %v3632_v19 }
 0x400   :  { %v3213_v3 = vpop.eup %3212 }
 0x401   :  { %v1280_v63 = vmul.f32 %v3213_v3, %v3636_v29 }
 0x403   :  { %2845 = vmatprep.mubr.msk.f32.mxu1 %vm1114_vm8, %v1280_v63 }
 0x404   :  { %2846 = vmatmul.mubr.msk.f32.vlgmr.msra.gmra.mrb[8].mxu1 %vm1114_vm8, %v1281_v33  ;;  %v3246_v33 = vld [vmem:[%s3894_s1 + $0x20] sm:$0xff] }
 0x405   :  { %3017 = vmatpush3.bf16.msk.msra.mxu1 %vm3526_vm6, %v3553_v11  ;;  %v1235_v28 = vpop.xlane.xlu0 %1234 }
 0x406   :  { %3214 = vrcp.f32 %v1235_v28  ;;  %3026 = vmatprep.subr.msk.bf16.mxu1 %vm3526_vm6, %v3024_v57  ;;  %v1232_v59 = vpop.xlane.xlu1 %1231 }
 0x407   :  { %3216 = vrcp.f32 %v1232_v59 }
 0x409   :  { %v1241_v37 = vpop.xlane.xlu0 %1240 }
 0x40a   :  { %3218 = vrcp.f32 %v1241_v37  ;;  %v1238_v29 = vpop.xlane.xlu1 %1237 }
 0x40b   :  { %3220 = vrcp.f32 %v1238_v29 }
 0x40d   :  { %v1247_v19 = vpop.xlane.xlu0 %1246 }
 0x40e   :  { %v1244_v60 = vpop.xlane.xlu1 %1243 }
 0x40f   :  { %3222 = vrcp.f32 %v1244_v60 }
 0x410   :  { %v3215_v61 = vpop.eup %3214  ;;  %3224 = vrcp.f32 %v1247_v19 }
 0x411   :  { %v3217_v34 = vpop.eup %3216  ;;  %v1253_v36 = vpop.xlane.xlu0 %1252  ;;  %v1283_v10 = vmul.f32 %v3215_v61, %v3648_v47 }
 0x412   :  { %3226 = vrcp.f32 %v1253_v36  ;;  %v1250_v11 = vpop.xlane.xlu1 %1249  ;;  %v1282_v6 = vmul.f32 %v3217_v34, %v3650_v48 }
 0x413   :  { %3228 = vrcp.f32 %v1250_v11 }
 0x414   :  { %v3219_v12 = vpop.eup %3218  ;;  %2852 = vmatprep.mubr.msk.f32.mxu0 %vm1114_vm8, %v1282_v6 }
 0x415   :  { %v3221_v23 = vpop.eup %3220  ;;  %v1259_v16 = vpop.xlane.xlu0 %1258  ;;  %2853 = vmatmul.mubr.msk.f32.vlgmr.msra.gmra.mrb[18].mxu0 %vm1114_vm8, %v1283_v10  ;;  %v1285_v47 = vmul.f32 %v3219_v12, %v3658_v51 }
 0x416   :  { %3230 = vrcp.f32 %v1259_v16  ;;  %v1256_v14 = vpop.xlane.xlu1 %1255  ;;  %v1284_v48 = vmul.f32 %v3221_v23, %v3660_v9 }
 0x417   :  { %3232 = vrcp.f32 %v1256_v14 }
 0x418   :  { %2859 = vmatprep.mubr.msk.f32.mxu1 %vm1114_vm8, %v1284_v48 }
 0x419   :  { %v3223_v25 = vpop.eup %3222  ;;  %v3142_v31 = vpop.permute.xlu0 %3141  ;;  %2860 = vmatmul.mubr.msk.f32.vlgmr.msra.gmra.mrb[10].mxu1 %vm1114_vm8, %v1285_v47 }
 0x41a   :  { %v3144_v53 = vunpack.i.h.bf16 %v3142_v31  ;;  %v3143_v27 = vunpack.i.l.bf16 %v3142_v31  ;;  %3029 = vmatpush3.bf16.msk.msra.mxu1 %vm3526_vm6, %v3024_v57  ;;  %v3147_v1 = vpop.permute.xlu1 %3146  ;;  %v1286_v2 = vmul.f32 %v3223_v25, %v3668_v41  ;;  %v3225_v5 = vpop.eup %3224  ;;  %v3247_v57 = vld [vmem:[%s3894_s1 + $0x30] sm:$0xff] }
 0x41b   :  { %v3149_v55 = vunpack.i.h.bf16 %v3147_v1  ;;  %v3148_v9 = vunpack.i.l.bf16 %v3147_v1  ;;  %3036 = vmatprep.subr.bf16.mxu1 %v3252_v0  ;;  %v1287_v24 = vmul.f32 %v3225_v5, %v3666_v15  ;;  %v3155_v28 = vpack.i.bf16 %v3247_v57, %v3246_v33 }
 0x41c   :  { %v3227_v51 = vpop.eup %3226  ;;  %v3018_v22 = vpack.c.bf16 %v3144_v53, %v3143_v27  ;;  %2866 = vmatprep.mubr.msk.f32.mxu0 %vm1114_vm8, %v1286_v2 }
 0x41d   :  { %v3229_v38 = vpop.eup %3228  ;;  %v3030_v39 = vpack.c.bf16 %v3149_v55, %v3148_v9  ;;  %v1289_v21 = vmul.f32 %v3227_v51, %v3674_v17  ;;  %v3152_v17 = vpop.permute.xlu0 %3151 }
 0x41e   :  { %3020 = vmatprep.subr.msk.bf16.mxu0 %vm3526_vm6, %v3018_v22  ;;  %v1288_v40 = vmul.f32 %v3229_v38, %v3676_v18  ;;  %v3154_v43 = vunpack.i.h.bf16 %v3152_v17 }
 0x41f   :  { %3023 = vmatpush3.bf16.msk.msra.mxu0 %vm3526_vm6, %v3018_v22 }
 0x420   :  { %v3231_v41 = vpop.eup %3230  ;;  %2873 = vmatprep.mubr.msk.f32.mxu1 %vm1114_vm8, %v1288_v40  ;;  %3032 = vmatprep.subr.msk.bf16.mxu0 %vm3526_vm6, %v3030_v39 }
 0x421   :  { %v3233_v42 = vpop.eup %3232  ;;  %2874 = vmatmul.mubr.msk.f32.vlgmr.msra.gmra.mrb[12].mxu1 %vm1114_vm8, %v1289_v21  ;;  %v1291_v15 = vmul.f32 %v3231_v41, %v3682_v52 }
 0x422   :  { %2867 = vmatmul.mubr.msk.f32.vlgmr.msra.gmra.mrb[20].mxu0 %vm1114_vm8, %v1287_v24  ;;  %v1290_v18 = vmul.f32 %v3233_v42, %v3684_v26  ;;  %2891 = vmatprep.mubr.msk.f32.mxu1 %vm3253_vm0, %v3254_v4  ;;  %v3153_v26 = vunpack.i.l.bf16 %v3152_v17 }
 0x423   :  { %3035 = vmatpush3.bf16.msk.msra.mxu0 %vm3526_vm6, %v3030_v39 }
 0x424   :  { %2880 = vmatprep.mubr.msk.f32.mxu0 %vm1114_vm8, %v1290_v18  ;;  %3042 = vmatprep.subr.bf16.mxu0 %v3252_v0  ;;  %v3037_v54 = vpack.c.bf16 %v3154_v43, %v3153_v26 }
 0x426   :  { %2881 = vmatmul.mubr.msk.f32.vlgmr.msra.gmra.mrb[22].mxu0 %vm1114_vm8, %v1291_v15  ;;  %3038 = vmatpush3.bf16.msra.mxu1 %v3037_v54 }
 0x427   :  { %2908 = vmatprep.mubr.msk.f32.mxu0 %vm3253_vm0, %v3254_v4  ;;  %3039 = vmatprep.subr.bf16.mxu1 %v3252_v0 }
 0x48f   :  { %v2833_v58 = vpop.f32.mrb[14].mxu0 }
 0x490   :  { %v1372_v44 = vpop.f32.mrb[15].mxu0 }
 0x493   :  { %v3759_v30 = vpop.f32.mrb[16].mxu0 }
 0x494   :  { %v1460_v52 = vpop.f32.mrb[17].mxu0 }
 0x4d7   :  { %v2847_v35 = vpop.f32.mrb[8].mxu1 }
 0x4d8   :  { %2003 = vrot.lane.b32.xlu0 %v2847_v35, %s3263_s7  ;;  %v1548_v7 = vpop.f32.mrb[9].mxu1 }
 0x4dc   :  { %2001 = vrot.lane.b32.xlu0 %v1548_v7, %s3263_s7 }
 0x4e8   :  { %v2854_v45 = vpop.f32.mrb[18].mxu0 }
 0x4e9   :  { %v1636_v46 = vpop.f32.mrb[19].mxu0 }
 0x4ea   :  { %2005 = vrot.lane.b32.xlu1 %v1636_v46, %s3263_s7 }
 0x4ec   :  { %v2861_v49 = vpop.f32.mrb[10].mxu1 }
 0x4ed   :  { %v1724_v50 = vpop.f32.mrb[11].mxu1 }
 0x4ee   :  { %2017 = vrot.lane.b32.xlu1 %v1724_v50, %s3264_s8 }
 0x4f4   :  { %v2875_v62 = vpop.f32.mrb[12].mxu1 }
 0x4f5   :  { %v2868_v32 = vpop.f32.mrb[20].mxu0  ;;  %v1900_v3 = vpop.f32.mrb[13].mxu1 }
 0x4f6   :  { %v1812_v56 = vpop.f32.mrb[21].mxu0  ;;  %2033 = vrot.lane.b32.xlu0 %v1900_v3, %s3265_s9  ;;  %v3806_v3 = vld [vmem:[%s3896_s2] sm:$0xff] }
 0x4f7   :  { %2021 = vrot.lane.b32.xlu1 %v1812_v56, %s3264_s8 }
 0x4f9   :  { %v2882_v8 = vpop.f32.mrb[22].mxu0 }
 0x4fa   :  { %v1988_v63 = vpop.f32.mrb[23].mxu0  ;;  %2019 = vrot.lane.b32.xlu0 %v2861_v49, %s3264_s8 }
 0x4fb   :  { %2035 = vrot.lane.b32.xlu1 %v2875_v62, %s3265_s9 }
 0x4fe   :  { %3156 = vrot.lane.b32.xlu0 %v3155_v28, %s3262_s6 }
 0x4ff   :  { %2037 = vrot.lane.b32.xlu1 %v1988_v63, %s3265_s9 }
 0x502   :  { %2023 = vrot.lane.b32.xlu0 %v2868_v32, %s3264_s8  ;;  %v2113_v32 = vsub.s32 1, %v3326_v13 }
 0x503   :  { %2007 = vrot.lane.b32.xlu1 %v2854_v45, %s3263_s7 }
 0x504   :  { %v2114_v56 = vrot.slane %v3806_v3, %v2113_v32 }
 0x507   :  { %2039 = vrot.lane.b32.xlu1 %v2882_v8, %s3265_s9 }
 0x54a   :  { %v2004_v59 = vpop.permute.xlu0 %2003 }
 0x54b   :  { %v2046_v12 = vsel %vm253_vm2, %v2833_v58, %v2004_v59 }
 0x54e   :  { %v2002_v29 = vpop.permute.xlu0 %2001 }
 0x54f   :  { %v2045_v60 = vsel %vm253_vm2, %v1372_v44, %v2002_v29 }
 0x55c   :  { %v2006_v37 = vpop.permute.xlu1 %2005 }
 0x55d   :  { %v2047_v31 = vsel %vm253_vm2, %v1460_v52, %v2006_v37 }
 0x560   :  { %v2018_v19 = vpop.permute.xlu1 %2017 }
 0x561   :  { %v2050_v61 = vsel %vm2049_vm9, %v2045_v60, %v2018_v19  ;;  %v3250_v19 = vld [vmem:[%s3895_s0 + $0x8] sm:$0xff] }
 0x568   :  { %v2034_v34 = vpop.permute.xlu0 %2033 }
 0x569   :  { %v2055_v36 = vsel %vm2054_vm10, %v2050_v61, %v2034_v34  ;;  %v2022_v11 = vpop.permute.xlu1 %2021 }
 0x56a   :  { %v2063_v6 = vcombine.high %v2055_v36, %v2055_v36  ;;  %v2070_v10 = vrot.slane %v2055_v36, %v3333_v20  ;;  %v2052_v5 = vsel %vm2049_vm9, %v2047_v31, %v2022_v11 }
 0x56c   :  { %v2077_v23 = vrot.slane %v2063_v6, %v3333_v20  ;;  %v2078_v16 = vcombine.high %v2070_v10, %v2070_v10  ;;  %v2020_v14 = vpop.permute.xlu0 %2019  ;;  %v3251_v6 = vld [vmem:[%s3895_s0 + $0x10] sm:$0xf] }
 0x56d   :  { %v2051_v48 = vsel %vm2049_vm9, %v2046_v12, %v2020_v14  ;;  %v2036_v47 = vpop.permute.xlu1 %2035 }
 0x56e   :  { %v2079_v25 = vcombine.high %v2077_v23, %v2077_v23  ;;  %v2115_v53 = vcombine.low %v2070_v10, %v2078_v16  ;;  %v2056_v1 = vsel %vm2054_vm10, %v2051_v48, %v2036_v47 }
 0x56f   :  { %v2086_v39 = vrot.slane %v2056_v1, %v3333_v20 }
 0x570   :  { %v2116_v27 = vcombine.low %v2077_v23, %v2079_v25  ;;  %v3157_v2 = vpop.permute.xlu0 %3156  ;;  %v2123_v24 = vrot.slane %v2115_v53, %v3333_v20 }
 0x571   :  { %v3159_v55 = vunpack.i.h.bf16 %v3157_v2  ;;  %v3158_v9 = vunpack.i.l.bf16 %v3157_v2  ;;  %v2038_v51 = vpop.permute.xlu1 %2037 }
 0x572   :  { %v2130_v22 = vrot.slane %v2116_v27, %v3333_v20  ;;  %v2057_v38 = vsel %vm2054_vm10, %v2052_v5, %v2038_v51 }
 0x573   :  { %v3040_v40 = vpack.c.bf16 %v3159_v55, %v3158_v9  ;;  %v2087_v21 = vcombine.high %v2057_v38, %v2057_v38  ;;  %v2094_v41 = vrot.slane %v2057_v38, %v3333_v20  ;;  %v20_v38 = vld [vmem:[%s3894_s1 + $0x18] sm:$0xff] }
 0x574   :  { %v2131_v43 = vcombine.low %v2123_v24, %v2130_v22  ;;  %v2024_v58 = vpop.permute.xlu0 %2023  ;;  %v18_v22 = vld [vmem:[%s3894_s1 + $0x8] sm:$0xff] }
 0x575   :  { %v2101_v42 = vrot.slane %v2087_v21, %v3333_v20  ;;  %v2102_v18 = vcombine.high %v2094_v41, %v2094_v41  ;;  %v2132_v15 = vcombine.low %v2086_v39, %v2094_v41  ;;  %v2008_v17 = vpop.permute.xlu1 %2007  ;;  %3041 = vmatpush3.bf16.msra.mxu1 %v3040_v40  ;;  %v3043_v39 = vpack.c.bf16 %v20_v38, %v18_v22  ;;  %v22_v40 = vld [vmem:[%s3894_s1 + $0x28] sm:$0xff]  ;;  %v24_v21 = vld [vmem:[%s3894_s1 + $0x38] sm:$0xff] }
 0x576   :  { %v2048_v26 = vsel %vm253_vm2, %v3759_v30, %v2008_v17  ;;  %3048 = vmatprep.subr.bf16.mxu1 %v3252_v0  ;;  %v3046_v41 = vpack.c.bf16 %v24_v21, %v22_v40  ;;  %v3160_v24 = vpack.i.bf16 %v20_v38, %v18_v22 }
 0x577   :  { %v2133_v54 = vcombine.low %v2102_v18, %v2101_v42  ;;  %v2140_v44 = vrot.slane %v2132_v15, %v3333_v20  ;;  %v2053_v7 = vsel %vm2049_vm9, %v2048_v26, %v2024_v58  ;;  %v2103_v46 = vcombine.high %v2101_v42, %v2101_v42  ;;  %3044 = vmatpush3.bf16.msra.mxu0 %v3043_v39 }
 0x578   :  { %2892 = vmatmul.mubr.msk.f32.vlgmr.msra.gmra.mrb[14].mxu1 %vm30_vm1, %v2131_v43  ;;  %3045 = vmatprep.subr.bf16.mxu0 %v3252_v0  ;;  %v3165_v42 = vpack.i.bf16 %v24_v21, %v22_v40 }
 0x579   :  { %v2147_v52 = vrot.slane %v2133_v54, %v3333_v20  ;;  %v2040_v35 = vpop.permute.xlu1 %2039  ;;  %2894 = vmatprep.mubr.msk.f32.mxu1 %vm3253_vm0, %v3254_v4 }
 0x57a   :  { %v2058_v45 = vsel %vm2054_vm10, %v2053_v7, %v2040_v35  ;;  %v2312_v7 = vsub.s32 5, %v3326_v13 }
 0x57b   :  { %v2110_v30 = vrot.slane %v2058_v45, %v3333_v20  ;;  %v2148_v49 = vcombine.low %v2140_v44, %v2147_v52  ;;  %3047 = vmatpush3.bf16.msra.mxu0 %v3046_v41  ;;  %v2305_v52 = vsub.s32 4, %v3326_v13 }
 0x57d   :  { %v2149_v50 = vcombine.low %v2103_v46, %v2110_v30  ;;  %2895 = vmatmul.mubr.msk.f32.gmra.mrb[16].mxu1 %vm30_vm1, %v2148_v49  ;;  %v2306_v45 = vrot.slane %v3806_v3, %v2305_v52  ;;  %v2313_v49 = vrot.slane %v3806_v3, %v2312_v7 }
 0x57e   :  { %2897 = vmatprep.mubr.msk.f32.mxu1 %vm3253_vm0, %v3254_v4 }
 0x57f   :  { %v2156_v62 = vrot.slane %v2149_v50, %v3333_v20  ;;  %v3249_v20 = vld [vmem:[%s3895_s0] sm:$0xff] }
 0x581   :  { %2898 = vmatmul.mubr.msk.f32.gmra.mrb[18].mxu1 %vm30_vm1, %v2156_v62 }
 0x582   :  { %2925 = vmatprep.mubr.msk.f32.mxu1 %vm3253_vm0, %v3254_v4 }
 0x64b   :  { %v2245_v8 = vpop.f32.mrb[14].mxu1 }
 0x64c   :  { %v2246_v63 = vadd.f32 %v2245_v8, %v2114_v56  ;;  %v2893_v33 = vpop.f32.mrb[15].mxu1 }
 0x64e   :  { %v2259_v57 = vadd.f32 %v3249_v20, %v2246_v63 }
 0x650   :  { %v2250_v28 = vpop.f32.mrb[16].mxu1  ;;  %v2262_v59 = vsel %vm30_vm1, %v2259_v57, 0.0 }
 0x651   :  { %v2251_v37 = vadd.f32 %v2250_v28, %v2114_v56  ;;  %2263 = vadd.xlane.f32.xlu0 %v2262_v59  ;;  %v2896_v29 = vpop.f32.mrb[17].mxu1 }
 0x653   :  { %v2260_v60 = vadd.f32 %v3250_v19, %v2251_v37 }
 0x654   :  { %v2255_v61 = vpop.f32.mrb[18].mxu1 }
 0x655   :  { %v2256_v34 = vadd.f32 %v2255_v61, %v2114_v56  ;;  %v2899_v36 = vpop.f32.mrb[19].mxu1  ;;  %v2265_v11 = vsel %vm30_vm1, %v2260_v60, 0.0 }
 0x656   :  { %2266 = vadd.xlane.f32.xlu1 %v2265_v11 }
 0x657   :  { %v2261_v10 = vadd.f32 %v3251_v6, %v2256_v34  ;;  %v2319_v6 = vsub.s32 2, %v3326_v13 }
 0x659   :  { %v2269_v12 = vsel %vm2268_vm11, %v2261_v10, 0.0 }
 0x65a   :  { %2270 = vadd.xlane.f32.xlu0 %v2269_v12 }
 0x6de   :  { %v2264_v23 = vpop.xlane.xlu0 %2263 }
 0x6df   :  { %v2273_v16 = vmul.f32 0.03125, %v2264_v23 }
 0x6e1   :  { %v2276_v14 = vsub.f32 %v2259_v57, %v2273_v16 }
 0x6e3   :  { %v2267_v48 = vpop.xlane.xlu1 %2266  ;;  %v2279_v47 = vmul.f32 %v2276_v14, %v2276_v14 }
 0x6e4   :  { %v2274_v25 = vmul.f32 0.03125, %v2267_v48 }
 0x6e5   :  { %v2282_v31 = vsel %vm30_vm1, %v2279_v47, 0.0 }
 0x6e6   :  { %v2277_v53 = vsub.f32 %v2260_v60, %v2274_v25  ;;  %2283 = vadd.xlane.f32.xlu0 %v2282_v31 }
 0x6e7   :  { %v2271_v27 = vpop.xlane.xlu0 %2270 }
 0x6e8   :  { %v2275_v1 = vmul.f32 0.03125, %v2271_v27  ;;  %v2280_v2 = vmul.f32 %v2277_v53, %v2277_v53 }
 0x6ea   :  { %v2278_v5 = vsub.f32 %v2261_v10, %v2275_v1  ;;  %v2285_v55 = vsel %vm30_vm1, %v2280_v2, 0.0  ;;  %v2320_v10 = vrot.slane %v3806_v3, %v2319_v6  ;;  %v2415_v2 = vsub.s32 3, %v3326_v13 }
 0x6eb   :  { %2286 = vadd.xlane.f32.xlu1 %v2285_v55 }
 0x6ec   :  { %v2281_v9 = vmul.f32 %v2278_v5, %v2278_v5 }
 0x6ee   :  { %v2288_v51 = vsel %vm2268_vm11, %v2281_v9, 0.0 }
 0x6ef   :  { %2289 = vadd.xlane.f32.xlu0 %v2288_v51 }
 0x6fc   :  { %3161 = vrot.lane.b32.xlu1 %v3160_v24, %s3260_s5 }
 0x705   :  { %3166 = vrot.lane.b32.xlu0 %v3165_v42, %s3260_s5 }
 0x773   :  { %v2284_v18 = vpop.xlane.xlu0 %2283 }
 0x774   :  { %v2291_v15 = vmul.f32 0.03125, %v2284_v18 }
 0x776   :  { %v2294_v17 = vadd.f32 1e-05, %v2291_v15 }
 0x778   :  { %3234 = vrsqrt.f32 %v2294_v17  ;;  %v2287_v43 = vpop.xlane.xlu1 %2286 }
 0x779   :  { %v2292_v26 = vmul.f32 0.03125, %v2287_v43 }
 0x77b   :  { %v2295_v54 = vadd.f32 1e-05, %v2292_v26 }
 0x77c   :  { %v2290_v58 = vpop.xlane.xlu0 %2289  ;;  %v3162_v62 = vpop.permute.xlu1 %3161 }
 0x77d   :  { %3236 = vrsqrt.f32 %v2295_v54  ;;  %v2293_v44 = vmul.f32 0.03125, %v2290_v58  ;;  %v3164_v8 = vunpack.i.h.bf16 %v3162_v62  ;;  %v3163_v63 = vunpack.i.l.bf16 %v3162_v62 }
 0x77f   :  { %v2296_v35 = vadd.f32 1e-05, %v2293_v44  ;;  %v3049_v28 = vpack.c.bf16 %v3164_v8, %v3163_v63 }
 0x780   :  { %v3167_v57 = vpop.permute.xlu0 %3166 }
 0x781   :  { %3238 = vrsqrt.f32 %v2296_v35  ;;  %3051 = vmatpush3.bf16.xpose.msk.msra.mxu1 %vm3845_vm13, %v3049_v28  ;;  %v3169_v29 = vunpack.i.h.bf16 %v3167_v57  ;;  %v3168_v19 = vunpack.i.l.bf16 %v3167_v57 }
 0x782   :  { %v3235_v46 = vpop.eup %3234  ;;  %3052 = vmatprep.subr.bf16.mxu1 %v3252_v0 }
 0x783   :  { %v2300_v30 = vmul.f32 %v3235_v46, %v2276_v14  ;;  %v3053_v36 = vpack.c.bf16 %v3169_v29, %v3168_v19  ;;  %v2578_v29 = vsub.s32 7, %v3326_v13 }
 0x785   :  { %v2307_v50 = vmul.f32 %v2306_v45, %v2300_v30 }
 0x787   :  { %v3237_v32 = vpop.eup %3236  ;;  %v2314_v56 = vadd.f32 %v2313_v49, %v2307_v50 }
 0x788   :  { %v2301_v33 = vmul.f32 %v3237_v32, %v2277_v53 }
 0x789   :  { %2909 = vmatmul.mubr.msk.f32.vlgmr.msra.gmra.mrb[24].mxu0 %vm30_vm1, %v2314_v56  ;;  %3055 = vmatpush3.bf16.xpose.msk.msra.mxu1 %vm3845_vm13, %v3053_v36 }
 0x78a   :  { %2911 = vmatprep.mubr.msk.f32.mxu0 %vm3253_vm0, %v3254_v4  ;;  %v2308_v59 = vmul.f32 %v2306_v45, %v2301_v33 }
 0x78b   :  { %v3239_v37 = vpop.eup %3238 }
 0x78c   :  { %v2315_v60 = vadd.f32 %v2313_v49, %v2308_v59  ;;  %v2302_v61 = vmul.f32 %v3239_v37, %v2278_v5  ;;  %v2416_v5 = vrot.slane %v3806_v3, %v2415_v2  ;;  %v2571_v59 = vsub.s32 6, %v3326_v13 }
 0x78e   :  { %2912 = vmatmul.mubr.msk.f32.gmra.mrb[26].mxu0 %vm30_vm1, %v2315_v60  ;;  %v2309_v34 = vmul.f32 %v2306_v45, %v2302_v61 }
 0x78f   :  { %2914 = vmatprep.mubr.msk.f32.mxu0 %vm3253_vm0, %v3254_v4 }
 0x790   :  { %v2316_v11 = vadd.f32 %v2313_v49, %v2309_v34  ;;  %v2579_v34 = vrot.slane %v3806_v3, %v2578_v29 }
 0x792   :  { %2915 = vmatmul.mubr.msk.f32.gmra.mrb[28].mxu0 %vm30_vm1, %v2316_v11 }
 0x85c   :  { %v2396_v12 = vpop.f32.mrb[24].mxu0 }
 0x85d   :  { %v2397_v23 = vadd.f32 %v2396_v12, %v2320_v10  ;;  %v2910_v0 = vpop.f32.mrb[25].mxu0 }
 0x85f   :  { %v2410_v16 = vmax.f32 %v2397_v23, 0.0 }
 0x861   :  { %v2401_v14 = vpop.f32.mrb[26].mxu0  ;;  %2926 = vmatmul.mubr.msk.f32.vlgmr.msra.gmra.mrb[20].mxu1 %vm2429_vm12, %v2410_v16 }
 0x862   :  { %v2402_v48 = vadd.f32 %v2401_v14, %v2320_v10  ;;  %v2913_v47 = vpop.f32.mrb[27].mxu0  ;;  %2928 = vmatprep.mubr.msk.f32.mxu1 %vm3253_vm0, %v3254_v4 }
 0x864   :  { %v2411_v25 = vmax.f32 %v2402_v48, 0.0 }
 0x865   :  { %v2406_v31 = vpop.f32.mrb[28].mxu0 }
 0x866   :  { %v2407_v53 = vadd.f32 %v2406_v31, %v2320_v10  ;;  %v2916_v27 = vpop.f32.mrb[29].mxu0  ;;  %2929 = vmatmul.mubr.msk.f32.gmra.mrb[22].mxu1 %vm2429_vm12, %v2411_v25 }
 0x867   :  { %2931 = vmatprep.mubr.msk.f32.mxu1 %vm3253_vm0, %v3254_v4 }
 0x868   :  { %v2412_v1 = vmax.f32 %v2407_v53, 0.0 }
 0x86a   :  { %2932 = vmatmul.mubr.msk.f32.gmra.mrb[24].mxu1 %vm2429_vm12, %v2412_v1 }
 0x934   :  { %v2513_v55 = vpop.f32.mrb[20].mxu1 }
 0x935   :  { %v2514_v9 = vadd.f32 %v2513_v55, %v2416_v5  ;;  %v2927_v51 = vpop.f32.mrb[21].mxu1 }
 0x937   :  { %v2527_v22 = vadd.f32 %v2514_v9, %v2314_v56 }
 0x939   :  { %v2518_v38 = vpop.f32.mrb[22].mxu1  ;;  %v2530_v39 = vsel %vm30_vm1, %v2527_v22, 0.0 }
 0x93a   :  { %v2519_v40 = vadd.f32 %v2518_v38, %v2416_v5  ;;  %2531 = vadd.xlane.f32.xlu1 %v2530_v39  ;;  %v2930_v21 = vpop.f32.mrb[23].mxu1 }
 0x93c   :  { %v2528_v41 = vadd.f32 %v2519_v40, %v2315_v60  ;;  %v2572_v60 = vrot.slane %v3806_v3, %v2571_v59 }
 0x93d   :  { %v2523_v24 = vpop.f32.mrb[24].mxu1 }
 0x93e   :  { %v2524_v4 = vadd.f32 %v2523_v24, %v2416_v5  ;;  %v2933_v42 = vpop.f32.mrb[25].mxu1  ;;  %v2533_v18 = vsel %vm30_vm1, %v2528_v41, 0.0 }
 0x93f   :  { %2534 = vadd.xlane.f32.xlu0 %v2533_v18 }
 0x940   :  { %v2529_v15 = vadd.f32 %v2524_v4, %v2316_v11 }
 0x942   :  { %v2536_v17 = vsel %vm2268_vm11, %v2529_v15, 0.0 }
 0x943   :  { %2537 = vadd.xlane.f32.xlu1 %v2536_v17 }
 0x9c7   :  { %v2532_v43 = vpop.xlane.xlu1 %2531 }
 0x9c8   :  { %v2539_v26 = vmul.f32 0.03125, %v2532_v43 }
 0x9ca   :  { %v2542_v54 = vsub.f32 %v2527_v22, %v2539_v26 }
 0x9cc   :  { %v2535_v58 = vpop.xlane.xlu0 %2534  ;;  %v2545_v44 = vmul.f32 %v2542_v54, %v2542_v54 }
 0x9cd   :  { %v2540_v52 = vmul.f32 0.03125, %v2535_v58 }
 0x9ce   :  { %v2548_v35 = vsel %vm30_vm1, %v2545_v44, 0.0 }
 0x9cf   :  { %v2543_v7 = vsub.f32 %v2528_v41, %v2540_v52  ;;  %2549 = vadd.xlane.f32.xlu0 %v2548_v35 }
 0x9d0   :  { %v2538_v45 = vpop.xlane.xlu1 %2537 }
 0x9d1   :  { %v2541_v46 = vmul.f32 0.03125, %v2538_v45  ;;  %v2546_v30 = vmul.f32 %v2543_v7, %v2543_v7 }
 0x9d3   :  { %v2544_v49 = vsub.f32 %v2529_v15, %v2541_v46  ;;  %v2551_v50 = vsel %vm30_vm1, %v2546_v30, 0.0 }
 0x9d4   :  { %2552 = vadd.xlane.f32.xlu1 %v2551_v50 }
 0x9d5   :  { %v2547_v62 = vmul.f32 %v2544_v49, %v2544_v49 }
 0x9d7   :  { %v2554_v32 = vsel %vm2268_vm11, %v2547_v62, 0.0 }
 0x9d8   :  { %2555 = vadd.xlane.f32.xlu0 %v2554_v32 }
 0xa5c   :  { %v2550_v56 = vpop.xlane.xlu0 %2549 }
 0xa5d   :  { %v2557_v8 = vmul.f32 0.03125, %v2550_v56 }
 0xa5f   :  { %v2560_v63 = vadd.f32 1e-05, %v2557_v8 }
 0xa61   :  { %3240 = vrsqrt.f32 %v2560_v63  ;;  %v2553_v33 = vpop.xlane.xlu1 %2552 }
 0xa62   :  { %v2558_v20 = vmul.f32 0.03125, %v2553_v33 }
 0xa64   :  { %v2561_v57 = vadd.f32 1e-05, %v2558_v20 }
 0xa65   :  { %v2556_v28 = vpop.xlane.xlu0 %2555 }
 0xa66   :  { %3242 = vrsqrt.f32 %v2561_v57  ;;  %v2559_v37 = vmul.f32 0.03125, %v2556_v28 }
 0xa68   :  { %v2562_v19 = vadd.f32 1e-05, %v2559_v37 }
 0xa6a   :  { %3244 = vrsqrt.f32 %v2562_v19 }
 0xa6b   :  { %v3241_v61 = vpop.eup %3240 }
 0xa6c   :  { %v2566_v36 = vmul.f32 %v3241_v61, %v2542_v54 }
 0xa6e   :  { %v2573_v11 = vmul.f32 %v2572_v60, %v2566_v36 }
 0xa70   :  { %v3243_v6 = vpop.eup %3242  ;;  %v2580_v10 = vadd.f32 %v2579_v34, %v2573_v11 }
 0xa71   :  { %v2567_v12 = vmul.f32 %v3243_v6, %v2543_v7 }
 0xa72   :  { %2583 = vst.msk [vmem:[%s3897_s3] sm:$0xff] %vm30_vm1, %v2580_v10 }
 0xa73   :  { %v2574_v23 = vmul.f32 %v2572_v60, %v2567_v12 }
 0xa74   :  { %v3245_v0 = vpop.eup %3244 }
 0xa75   :  { %v2581_v13 = vadd.f32 %v2579_v34, %v2574_v23  ;;  %v2568_v16 = vmul.f32 %v3245_v0, %v2544_v49 }
 0xa77   :  { %2584 = vst.msk [vmem:[%s3897_s3 + $0x8] sm:$0xff] %vm30_vm1, %v2581_v13  ;;  %v2575_v3 = vmul.f32 %v2572_v60, %v2568_v16 }
 0xa79   :  { %v2582_v14 = vadd.f32 %v2579_v34, %v2575_v3 }
 0xa7b   :  { %2585 = vst.msk [vmem:[%s3897_s3 + $0x10] sm:$0xf] %vm2268_vm11, %v2582_v14 }

</bundles_post_ra>
